<compile_context>
chip_gen: v7x
topology: tpu7x:2x2x1
jax: 0.10.0
libtpu: 0.0.40
codegen_flags: <defaults>
</compile_context>

<pallas_src>
import functools

import jax
import jax.numpy as jnp
from jax import lax
from jax.experimental import pallas as pl
from jax.experimental.pallas import tpu as pltpu

# Large finite negative (as in the upstream TPU flash-attention kernel) so
# masked keys underflow to 0 in exp() without producing inf/nan.
_MASK_VALUE = -0.7 * float(jnp.finfo(jnp.float32).max)


def _prelu(x, alpha):
    # nn.PReLU() default: single shared parameter, init 0.25.
    return jnp.where(x >= 0, x, alpha * x)


def _rep(v, n):
    """Broadcast a lane-replicated (rows, L) running stat against width n."""
    l = v.shape[-1]
    if l == 1 or l == n:
        return v
    assert n % l == 0, (l, n)
    # Lane-block copy (cheap) instead of a single-lane cross-lane broadcast.
    return jnp.concatenate([v] * (n // l), axis=-1)


def _nl_attn_kernel(e1_ref,            # (1, tq, Cr)  query projection tile
                    e2t_ref,           # (1, Cr, tk)  key projection, pre-transposed
                    asm_ref,           # (1, tk, C)   assembly (value) tile
                    o_ref,             # (1, tq, C)
                    m_ref, l_ref, acc_ref,   # VMEM scratch
                    *, hw, tk, c, mask_keys, approx, compute_dtype):
    kv = pl.program_id(2)

    @pl.when(kv == 0)
    def _init():
        m_ref[...] = jnp.full_like(m_ref, _MASK_VALUE)
        l_ref[...] = jnp.zeros_like(l_ref)
        acc_ref[...] = jnp.zeros_like(acc_ref)

    # Score tile (tq, tk): (tq, Cr) @ (Cr, tk) on the MXU, f32 accumulation.
    # e2 arrives pre-transposed from the prepass -> no per-step XLU transpose.
    s = jnp.dot(e1_ref[0], e2t_ref[0], preferred_element_type=jnp.float32)

    if mask_keys:
        # Mask zero-padded key positions (HW not divisible by tk).
        key_pos = kv * tk + lax.broadcasted_iota(jnp.int32, (1, tk), 1)
        s = jnp.where(key_pos < hw, s, _MASK_VALUE)

    # Online softmax with lane-replicated running stats.
    m_prev = m_ref[...]
    l_prev = l_ref[...]
    m_curr = jnp.max(s, axis=-1, keepdims=True)          # (tq, 1)
    m_next = jnp.maximum(m_prev, m_curr)                 # (tq, L) replicated
    corr = jnp.exp(m_prev - m_next)                      # (tq, L)
    p = jnp.exp(s - _rep(m_next, s.shape[-1]))           # (tq, tk) f32
    # NOTE: row-sum could be moved onto the MXU (p @ ones) if the bundle shows
    # the XLU saturated; left on the XLU for now.
    l_ref[...] = corr * l_prev + jnp.sum(p, axis=-1, keepdims=True)
    acc_ref[...] = _rep(corr, c) * acc_ref[...] + jnp.dot(
        p.astype(compute_dtype), asm_ref[0], preferred_element_type=jnp.float32)
    m_ref[...] = m_next

    @pl.when(kv == pl.num_programs(2) - 1)
    def _finalize():
        inv_l = pl.reciprocal(l_ref[...], approx=approx)
        o_ref[0] = (acc_ref[...] * _rep(inv_l, c)).astype(o_ref.dtype)


def _pick_tile(hw, cap=512):
    """Tile size for the flattened spatial axis: a multiple of 128, as large as
    practical (per-grid-step overhead dominates small tiles); padding + masking
    handle the remainder when hw is not an exact multiple."""
    cap = max(128, min(int(cap), 512))
    cands = [t for t in (512, 256, 128) if t <= cap]
    for t in cands:
        if hw % t == 0:
            return t
    # No exact divisor: minimise padded work, then prefer the larger tile.
    return min(cands, key=lambda t: (pl.cdiv(hw, t) * t, -t))


def nonlocal_attention(x_nchw, params, *, compute_dtype=jnp.bfloat16,
                       tq=None, tk=None):
    N, C, H, W = x_nchw.shape
    HW = H * W
    Cr = params["w1"].shape[1]

    compute_dtype = jnp.dtype(compute_dtype)
    approx = compute_dtype != jnp.dtype(jnp.float32)

    if tq is None:
        tq = _pick_tile(HW)
        # Keep >= 2 programs on the parallel grid axes so v7x's two TensorCores
        # both get work.
        while N * pl.cdiv(HW, tq) < 2 and tq > 128:
            tq //= 2
    if tk is None:
        tk = min(_pick_tile(HW), tq)          # default tq >= tk

    HWq = pl.cdiv(HW, tq) * tq
    HWk = pl.cdiv(HW, tk) * tk

    # ---- Projection prepass (plain XLA; one fused GEMM reading x once) ------
    # NCHW -> (N, HW, C); cast MXU inputs to the compute dtype (bf16 fast path).
    x = jnp.transpose(x_nchw, (0, 2, 3, 1)).reshape(N, HW, C).astype(compute_dtype)
    w = jnp.concatenate([params["w1"], params["w2"], params["w3"]],
                        axis=1).astype(compute_dtype)              # (C, 2*Cr + C)
    b = jnp.concatenate([params["b1"], params["b2"], params["b3"]],
                        axis=1).astype(jnp.float32)
    proj = jnp.einsum("nsc,cd->nsd", x, w,
                      preferred_element_type=jnp.float32) + b
    e1 = _prelu(proj[..., :Cr], params["a1"][0, 0])          # conv_match1
    e2 = _prelu(proj[..., Cr:2 * Cr], params["a2"][0, 0])    # conv_match2
    asm = _prelu(proj[..., 2 * Cr:], params["a3"][0, 0])     # conv_assembly

    # Kernel streams: zero-pad to tile multiples; e2 pre-transposed to (Cr, HW).
    e1 = jnp.pad(e1.astype(compute_dtype), ((0, 0), (0, HWq - HW), (0, 0)))
    e2t = jnp.pad(jnp.swapaxes(e2.astype(compute_dtype), 1, 2),
                  ((0, 0), (0, 0), (0, HWk - HW)))
    asm = jnp.pad(asm.astype(compute_dtype), ((0, 0), (0, HWk - HW), (0, 0)))

    stat_lanes = 128 if (C % 128 == 0 and tk % 128 == 0) else 1
    grid = (N, HWq // tq, HWk // tk)

    kernel = functools.partial(
        _nl_attn_kernel, hw=HW, tk=tk, c=C, mask_keys=(HWk != HW),
        approx=approx, compute_dtype=compute_dtype)

    # Explicit VMEM budget: double-buffered tiles + scratch + s/p intermediates.
    cb = compute_dtype.itemsize
    vmem_est = (2 * tq * Cr * cb + 2 * Cr * tk * cb + 2 * tk * C * cb
                + 2 * tq * C * cb                      # output tile
                + tq * C * 4 + 2 * tq * stat_lanes * 4  # acc + m/l scratch
                + 4 * tq * tk * 4)                      # s / p + headroom
    vmem_limit = int(min(64 * 2**20, max(32 * 2**20, 2 * vmem_est)))

    out = pl.pallas_call(
        kernel,
        out_shape=jax.ShapeDtypeStruct((N, HWq, C), compute_dtype),
        grid_spec=pltpu.PrefetchScalarGridSpec(
            num_scalar_prefetch=0,
            grid=grid,
            in_specs=[
                pl.BlockSpec((1, tq, Cr), lambda n, i, j: (n, i, 0)),   # e1 (query)
                pl.BlockSpec((1, Cr, tk), lambda n, i, j: (n, 0, j)),   # e2^T (key)
                pl.BlockSpec((1, tk, C), lambda n, i, j: (n, j, 0)),    # asm (value)
            ],
            out_specs=pl.BlockSpec((1, tq, C), lambda n, i, j: (n, i, 0)),
            scratch_shapes=[
                pltpu.VMEM((tq, stat_lanes), jnp.float32),   # running max
                pltpu.VMEM((tq, stat_lanes), jnp.float32),   # running sum
                pltpu.VMEM((tq, C), jnp.float32),            # output accumulator
            ],
        ),
        compiler_params=pltpu.CompilerParams(
            dimension_semantics=("parallel", "parallel", "arbitrary"),
            vmem_limit_bytes=vmem_limit),
    )(e1, e2t, asm)

    # Drop padded query rows; reshape/transpose in the compute dtype, cast last.
    out = out[:, :HW].reshape(N, H, W, C)
    return jnp.transpose(out, (0, 3, 1, 2)).astype(x_nchw.dtype)


def nonlocal_attention_ref(x_nchw, params):
    """Pure-JAX f32 reference mirroring the PyTorch forward."""
    N, C, H, W = x_nchw.shape
    HW = H * W
    x = jnp.transpose(x_nchw, (0, 2, 3, 1)).reshape(N, HW, C)
    e1 = _prelu(x @ params["w1"] + params["b1"], params["a1"][0, 0])
    e2 = _prelu(x @ params["w2"] + params["b2"], params["a2"][0, 0])
    asm = _prelu(x @ params["w3"] + params["b3"], params["a3"][0, 0])
    score = jnp.einsum("nqc,nkc->nqk", e1, e2)
    score = jax.nn.softmax(score, axis=2)
    out = jnp.einsum("nqk,nkc->nqc", score, asm)
    return jnp.transpose(out.reshape(N, H, W, C), (0, 3, 1, 2))


def make_params(key, channel, reduction):
    cr = channel // reduction
    ks = jax.random.split(key, 6)
    scale = 1.0 / jnp.sqrt(channel)
    return {
        "w1": jax.random.normal(ks[0], (channel, cr), jnp.float32) * scale,
        "b1": jax.random.normal(ks[1], (1, cr), jnp.float32) * 0.1,
        "a1": jnp.full((1, 1), 0.25, jnp.float32),
        "w2": jax.random.normal(ks[2], (channel, cr), jnp.float32) * scale,
        "b2": jax.random.normal(ks[3], (1, cr), jnp.float32) * 0.1,
        "a2": jnp.full((1, 1), 0.25, jnp.float32),
        "w3": jax.random.normal(ks[4], (channel, channel), jnp.float32) * scale,
        "b3": jax.random.normal(ks[5], (1, channel), jnp.float32) * 0.1,
        "a3": jnp.full((1, 1), 0.25, jnp.float32),
    }


if __name__ == "__main__":
    key = jax.random.PRNGKey(0)
    kx, kp, kx2 = jax.random.split(key, 3)

    # channel=128 (module default), reduction=2 -> embed dim 64; HW = 256.
    N, C, H, W = 2, 128, 16, 16
    x = jax.random.normal(kx, (N, C, H, W), jnp.float32)
    params = make_params(kp, channel=C, reduction=2)

    ref = nonlocal_attention_ref(x, params)

    # Exact-arithmetic path (f32 MXU inputs): verifies the tiled online-softmax math.
    out_f32 = jax.block_until_ready(
        nonlocal_attention(x, params, compute_dtype=jnp.float32))
    assert out_f32.shape == (N, C, H, W)
    assert bool(jnp.allclose(out_f32, ref, atol=1e-4, rtol=1e-4)), "f32 kernel mismatch"

    # Fast path (default): bf16 MXU inputs, f32 accumulation, approx reciprocal.
    out_bf16 = jax.block_until_ready(nonlocal_attention(x, params))
    assert out_bf16.shape == (N, C, H, W)
    assert bool(jnp.all(jnp.isfinite(out_bf16)))
    assert float(jnp.mean(jnp.abs(out_bf16 - ref))) < 0.1, "bf16 kernel diverged"

    # Ragged spatial size (HW = 143, not tile-aligned): exercises the
    # zero-padding + in-kernel key-masking path.
    H2, W2 = 11, 13
    x2 = jax.random.normal(kx2, (N, C, H2, W2), jnp.float32)
    ref2 = nonlocal_attention_ref(x2, params)
    out2 = jax.block_until_ready(
        nonlocal_attention(x2, params, compute_dtype=jnp.float32))
    assert out2.shape == (N, C, H2, W2)
    assert bool(jnp.allclose(out2, ref2, atol=1e-4, rtol=1e-4)), "masked kernel mismatch"

    print("KERNEL_OK")
</pallas_src>

<mosaic_0001>
module attributes {stable_mosaic.version = 11 : i64} {
  func.func @_nl_attn_kernel(%arg0: i32, %arg1: i32, %arg2: i32, %arg3: memref<1x256x64xf32, #tpu.memory_space<vmem>>, %arg4: memref<1x64x256xf32, #tpu.memory_space<vmem>>, %arg5: memref<1x256x128xf32, #tpu.memory_space<vmem>>, %arg6: memref<1x256x128xf32, #tpu.memory_space<vmem>>, %arg7: memref<256x128xf32, #tpu.memory_space<vmem>>, %arg8: memref<256x128xf32, #tpu.memory_space<vmem>>, %arg9: memref<256x128xf32, #tpu.memory_space<vmem>>) attributes {dimension_semantics = [#tpu.dimension_semantics<parallel>, #tpu.dimension_semantics<parallel>, #tpu.dimension_semantics<arbitrary>], iteration_bounds = array<i64: 2, 1, 1>, scalar_prefetch = 0 : i64, scratch_operands = 3 : i64, tpu.core_type = #tpu.core_type<tc>, window_params = [{transform_indices = @transform_0, window_bounds = array<i64: 1, 256, 64>}, {transform_indices = @transform_1, window_bounds = array<i64: 1, 64, 256>}, {transform_indices = @transform_2, window_bounds = array<i64: 1, 256, 128>}, {transform_indices = @transform_3, window_bounds = array<i64: 1, 256, 128>}]} {
    %c0_i32 = arith.constant 0 : i32
    %0 = arith.cmpi eq, %arg2, %c0_i32 : i32
    %1 = arith.extui %0 : i1 to i32
    %c0_i32_0 = arith.constant 0 : i32
    %2 = arith.cmpi ne, %1, %c0_i32_0 : i32
    scf.if %2 {
      %cst_26 = arith.constant -2.38197633E+38 : f32
      %36 = vector.broadcast %cst_26 : f32 to vector<256x128xf32>
      %c0_27 = arith.constant 0 : index
      %c0_28 = arith.constant 0 : index
      %37 = vector.load %arg7[%c0_27, %c0_28] : memref<256x128xf32, #tpu.memory_space<vmem>>, vector<256x128xf32>
      tpu.vector_store %arg7[%c0_27, %c0_28], %36 {strides = array<i32>} : memref<256x128xf32, #tpu.memory_space<vmem>>, vector<256x128xf32>,
      %cst_29 = arith.constant 0.000000e+00 : f32
      %38 = vector.broadcast %cst_29 : f32 to vector<256x128xf32>
      %c0_30 = arith.constant 0 : index
      %c0_31 = arith.constant 0 : index
      %39 = vector.load %arg8[%c0_30, %c0_31] : memref<256x128xf32, #tpu.memory_space<vmem>>, vector<256x128xf32>
      tpu.vector_store %arg8[%c0_30, %c0_31], %38 {strides = array<i32>} : memref<256x128xf32, #tpu.memory_space<vmem>>, vector<256x128xf32>,
      %cst_32 = arith.constant 0.000000e+00 : f32
      %40 = vector.broadcast %cst_32 : f32 to vector<256x128xf32>
      %c0_33 = arith.constant 0 : index
      %c0_34 = arith.constant 0 : index
      %41 = vector.load %arg9[%c0_33, %c0_34] : memref<256x128xf32, #tpu.memory_space<vmem>>, vector<256x128xf32>
      tpu.vector_store %arg9[%c0_33, %c0_34], %40 {strides = array<i32>} : memref<256x128xf32, #tpu.memory_space<vmem>>, vector<256x128xf32>,
    } else {
    }
    %c0 = arith.constant 0 : index
    %c0_1 = arith.constant 0 : index
    %c0_2 = arith.constant 0 : index
    %3 = vector.load %arg3[%c0, %c0_1, %c0_2] : memref<1x256x64xf32, #tpu.memory_space<vmem>>, vector<1x256x64xf32>
    %4 = vector.shape_cast %3 : vector<1x256x64xf32> to vector<256x64xf32>
    %c0_3 = arith.constant 0 : index
    %c0_4 = arith.constant 0 : index
    %c0_5 = arith.constant 0 : index
    %5 = vector.load %arg4[%c0_3, %c0_4, %c0_5] : memref<1x64x256xf32, #tpu.memory_space<vmem>>, vector<1x64x256xf32>
    %6 = vector.shape_cast %5 : vector<1x64x256xf32> to vector<64x256xf32>
    %cst = arith.constant dense<0.000000e+00> : vector<256x256xf32>
    %7 = tpu.matmul %4, %6, %cst {dimension_numbers = #tpu.dot_dimension_numbers<[1], [0], [0], [1], [0, 0, 1, 1], [], []>} : vector<256x64xf32>, vector<64x256xf32>, vector<256x256xf32> -> vector<256x256xf32>
    %c0_6 = arith.constant 0 : index
    %c0_7 = arith.constant 0 : index
    %8 = vector.load %arg7[%c0_6, %c0_7] : memref<256x128xf32, #tpu.memory_space<vmem>>, vector<256x128xf32>
    %c0_8 = arith.constant 0 : index
    %c0_9 = arith.constant 0 : index
    %9 = vector.load %arg8[%c0_8, %c0_9] : memref<256x128xf32, #tpu.memory_space<vmem>>, vector<256x128xf32>
    %cst_10 = arith.constant dense<0xFF800000> : vector<256xf32>
    %10 = vector.multi_reduction <maximumf>, %7, %cst_10 [1] : vector<256x256xf32> to vector<256xf32>
    %11 = vector.shape_cast %10 : vector<256xf32> to vector<256x1xf32>
    %12 = vector.broadcast %11 : vector<256x1xf32> to vector<256x128xf32>
    %13 = arith.maximumf %8, %12 : vector<256x128xf32>
    %14 = arith.subf %8, %13 : vector<256x128xf32>
    %15 = math.exp %14 : vector<256x128xf32>
    %16 = tpu.concatenate %13, %13 in 1 : vector<256x128xf32>, vector<256x128xf32> -> vector<256x256xf32>
    %17 = arith.subf %7, %16 : vector<256x256xf32>
    %18 = math.exp %17 : vector<256x256xf32>
    %19 = arith.mulf %15, %9 : vector<256x128xf32>
    %cst_11 = arith.constant dense<0.000000e+00> : vector<256xf32>
    %20 = vector.multi_reduction <add>, %18, %cst_11 [1] : vector<256x256xf32> to vector<256xf32>
    %21 = vector.shape_cast %20 : vector<256xf32> to vector<256x1xf32>
    %22 = vector.broadcast %21 : vector<256x1xf32> to vector<256x128xf32>
    %23 = arith.addf %19, %22 : vector<256x128xf32>
    %c0_12 = arith.constant 0 : index
    %c0_13 = arith.constant 0 : index
    %24 = vector.load %arg8[%c0_12, %c0_13] : memref<256x128xf32, #tpu.memory_space<vmem>>, vector<256x128xf32>
    tpu.vector_store %arg8[%c0_12, %c0_13], %23 {strides = array<i32>} : memref<256x128xf32, #tpu.memory_space<vmem>>, vector<256x128xf32>,
    %c0_14 = arith.constant 0 : index
    %c0_15 = arith.constant 0 : index
    %25 = vector.load %arg9[%c0_14, %c0_15] : memref<256x128xf32, #tpu.memory_space<vmem>>, vector<256x128xf32>
    %26 = arith.mulf %15, %25 : vector<256x128xf32>
    %c0_16 = arith.constant 0 : index
    %c0_17 = arith.constant 0 : index
    %c0_18 = arith.constant 0 : index
    %27 = vector.load %arg5[%c0_16, %c0_17, %c0_18] : memref<1x256x128xf32, #tpu.memory_space<vmem>>, vector<1x256x128xf32>
    %28 = vector.shape_cast %27 : vector<1x256x128xf32> to vector<256x128xf32>
    %cst_19 = arith.constant dense<0.000000e+00> : vector<256x128xf32>
    %29 = tpu.matmul %18, %28, %cst_19 {dimension_numbers = #tpu.dot_dimension_numbers<[1], [0], [0], [1], [0, 0, 1, 1], [], []>} : vector<256x256xf32>, vector<256x128xf32>, vector<256x128xf32> -> vector<256x128xf32>
    %30 = arith.addf %26, %29 : vector<256x128xf32>
    %c0_20 = arith.constant 0 : index
    %c0_21 = arith.constant 0 : index
    %31 = vector.load %arg9[%c0_20, %c0_21] : memref<256x128xf32, #tpu.memory_space<vmem>>, vector<256x128xf32>
    tpu.vector_store %arg9[%c0_20, %c0_21], %30 {strides = array<i32>} : memref<256x128xf32, #tpu.memory_space<vmem>>, vector<256x128xf32>,
    %c0_22 = arith.constant 0 : index
    %c0_23 = arith.constant 0 : index
    %32 = vector.load %arg7[%c0_22, %c0_23] : memref<256x128xf32, #tpu.memory_space<vmem>>, vector<256x128xf32>
    tpu.vector_store %arg7[%c0_22, %c0_23], %13 {strides = array<i32>} : memref<256x128xf32, #tpu.memory_space<vmem>>, vector<256x128xf32>,
    %c0_i32_24 = arith.constant 0 : i32
    %33 = arith.cmpi eq, %arg2, %c0_i32_24 : i32
    %34 = arith.extui %33 : i1 to i32
    %c0_i32_25 = arith.constant 0 : i32
    %35 = arith.cmpi ne, %34, %c0_i32_25 : i32
    scf.if %35 {
      %c0_26 = arith.constant 0 : index
      %c0_27 = arith.constant 0 : index
      %36 = vector.load %arg8[%c0_26, %c0_27] : memref<256x128xf32, #tpu.memory_space<vmem>>, vector<256x128xf32>
      %37 = tpu.reciprocal %36 : vector<256x128xf32> -> vector<256x128xf32>
      %c0_28 = arith.constant 0 : index
      %c0_29 = arith.constant 0 : index
      %38 = vector.load %arg9[%c0_28, %c0_29] : memref<256x128xf32, #tpu.memory_space<vmem>>, vector<256x128xf32>
      %39 = arith.mulf %38, %37 : vector<256x128xf32>
      %c0_30 = arith.constant 0 : index
      %c0_31 = arith.constant 0 : index
      %c0_32 = arith.constant 0 : index
      %40 = vector.load %arg6[%c0_30, %c0_31, %c0_32] : memref<1x256x128xf32, #tpu.memory_space<vmem>>, vector<1x256x128xf32>
      %41 = vector.shape_cast %40 : vector<1x256x128xf32> to vector<256x128xf32>
      %42 = vector.shape_cast %39 : vector<256x128xf32> to vector<1x256x128xf32>
      tpu.vector_store %arg6[%c0_30, %c0_31, %c0_32], %42 {strides = array<i32>} : memref<1x256x128xf32, #tpu.memory_space<vmem>>, vector<1x256x128xf32>,
    } else {
    }
    return
  }
  func.func @transform_0(%arg0: i32, %arg1: i32, %arg2: i32) -> (i32, i32, i32) {
    %c0_i32 = arith.constant 0 : i32
    %c0_i32_0 = arith.constant 0 : i32
    return %arg0, %arg1, %c0_i32 : i32, i32, i32
  }
  func.func @transform_1(%arg0: i32, %arg1: i32, %arg2: i32) -> (i32, i32, i32) {
    %c0_i32 = arith.constant 0 : i32
    %c0_i32_0 = arith.constant 0 : i32
    return %arg0, %c0_i32, %arg2 : i32, i32, i32
  }
  func.func @transform_2(%arg0: i32, %arg1: i32, %arg2: i32) -> (i32, i32, i32) {
    %c0_i32 = arith.constant 0 : i32
    %c0_i32_0 = arith.constant 0 : i32
    return %arg0, %arg2, %c0_i32 : i32, i32, i32
  }
  func.func @transform_3(%arg0: i32, %arg1: i32, %arg2: i32) -> (i32, i32, i32) {
    %c0_i32 = arith.constant 0 : i32
    %c0_i32_0 = arith.constant 0 : i32
    return %arg0, %arg1, %c0_i32 : i32, i32, i32
  }
}

</mosaic_0001>

<bundles_post_ra>
// kernel: tpu_custom_call.1
= control target key start
LH: loop header
LB: loop body
LE: loop exit
PB: predicated region body
PF: predicated region fallthrough
CT: control target
= control target key end

     0   :  { %8 = vsyncpa [#allocation6], 0  ;;  %s3735_s0 = inlined_call_operand.vmem [shape: f32[2,256,64], index: 0, kind: input, shape index: {}]   ;;  %s3736_s1 = inlined_call_operand.vmem [shape: f32[2,64,256], index: 1, kind: input, shape index: {}]   ;;  %s3737_s2 = inlined_call_operand.vmem [shape: f32[2,256,128], index: 2, kind: input, shape index: {}]   ;;  %s3738_s3 = inlined_call_operand.hbm [shape: f32[2,256,128], index: 3, kind: output, shape index: {}]  }
   0x1   :  { %10 = vsyncpa [#allocation6 + $0x1], 0  ;;  %s2736_s12 = smov 0   ;;  %s2738_s13 = smov 0  }
   0x2   :  { %s2740_s14 = smov 0   ;;  %s2742_s15 = smov 0  }
   0x3   :  { %s2744_s16 = smov 0   ;;  %s2746_s17 = smov 0  }
   0x4 LB: > { %s2167_s18 = sadd.s32 4294967295, %s2709_s17   ;;  %s2168_s19 = sadd.s32 4294967294, %s2709_s17   ;;  %s2709_s17 = sphi %s2746_s17, %s16_s17   ;;  %s2705_s16 = sphi %s2744_s16, %s3822_s16   ;;  %s2701_s15 = sphi %s2742_s15, %s3821_s15   ;;  %s2697_s14 = sphi %s2740_s14, %s3820_s14   ;;  %s2693_s13 = sphi %s2738_s13, %s3819_s13   ;;  %s2689_s12 = sphi %s2736_s12, %s3818_s12  }
   0x5   : > { %s35_s20 = sadd.s32 1, %s2705_s16  ;;  %s128_s21 = sadd.s32 1, %s2697_s14 }
   0x6   : > { %p37_p0 = scmp.ge.s32.totalorder %s35_s20, 2  ;;  %p138_p1 = scmp.ne.s32.totalorder %s2697_s14, %s2693_s13 }
   0x7   : > { %p139_p2 = scmp.eq.s32.totalorder %s2167_s18, 1  ;;  %p144_p3 = scmp.ne.s32.totalorder %s2693_s13, %s2689_s12 }
   0x8   : > { %s3824_s20 = smov (%p37_p0, %s35_s20), 0  ;;  %p145_p5 = scmp.eq.s32.totalorder %s2168_s19, 1 }
   0x9   : > { %p2776_p4 = por %p139_p2, %p138_p1  ;;  %s123_s23 = ssub.s32 %s2705_s16, %s3824_s20 }
   0xa   : > { %p2171_p6 = scmp.ge.s32.totalorder %s2709_s17, 1  ;;  %p126_p7 = scmp.eq.s32.totalorder %s123_s23, 0 }
   0xb   : > { %p2783_p8 = por %p145_p5, %p144_p3  ;;  %p202_p9 = scmp.lt.s32.totalorder %s2709_s17, 3 }
   0xc   : > { %s2789_s25 = scalar_select %p126_p7, %s2697_s14, %s128_s21  }
   0xd   : > { %p203_p10 = pnand %p2171_p6, %p202_p9 }
   0xf   : > { %206 = sbr.rel (%p203_p10) target bundleno = 780 (0x30c), region = 32 }
  0x16   : > { %p249_p11 = scmp.lt.s32.totalorder %s2701_s15, 1  ;;  %v2711_v0 = vmov 0.0   ;;  %vm427_vm0 = vcmask 523264   ;;  %v2712_v57 = vmov 0.0|0.0   ;;  %s245_s11 = sand.u32 1, %s2693_s13  }
  0x17   : > { %588 = vmatprep.mubr.f32.mxu0 %v2711_v0  ;;  %2284 = vmatprep.subr.bf16.mxu1 %v2712_v57  ;;  %s2172_s18 = sshll.u32 %s245_s11, 8  ;;  %s2219_s21 = sshll.u32 %s2701_s15, 12 }
  0x18   : > { %s2794_s26 = scalar_select %p249_p11, %s2701_s15, 1 }
  0x19   : > { %s3562_s19 = scalar_lea.vmem [#allocation5], %s2172_s18  ;;  %s3682_s28 = scalar_lea.hbm %s3738_s3, %s2219_s21 }
  0x1a   : > { %s2217_s27 = sshll.u32 %s2794_s26, 7  ;;  %s2216_s4 = sshll.u32 %s2794_s26, 8 }
  0x1b   : > { %s266_s30 = scalar_lea.vmem %s3736_s1, %s2217_s27  ;;  %s2806_s7 = scalar_lea.vmem %s3735_s0, %s2216_s4 }
  0x1c   : > { %v412_v1 = vld [vmem:[%s266_s30 + $0x8] sm:$0xff]  ;;  %v414_v2 = vld [vmem:[%s266_s30 + $0x18] sm:$0xff]  ;;  %v411_v3 = vld [vmem:[%s266_s30] sm:$0xff]  ;;  %s2908_s10 = scalar_lea.vmem %s3737_s2, %s2216_s4  ;;  %s2049_s23 = sshll.u32 %s3562_s19, 4  ;;  %s3684_s23 = int_to_ptr.vmem [resolvable:$true] %s2049_s23 }
  0x1d   : > { %v2220_v4 = vpack.c.bf16 %v414_v2, %v412_v1  ;;  %v413_v5 = vld [vmem:[%s266_s30 + $0x10] sm:$0xff]  ;;  %v416_v6 = vld [vmem:[%s266_s30 + $0x28] sm:$0xff]  ;;  %v418_v7 = vld [vmem:[%s266_s30 + $0x38] sm:$0xff]  ;;  %s3689_s15 = scalar_lea.sflag [#allocation6], %s245_s11  ;;  %s2631_s29 = scalar_lea.vmem %s3684_s23, 4096 }
  0x1e   : > { %v2222_v8 = vpack.c.bf16 %v413_v5, %v411_v3  ;;  %v2224_v9 = vpack.c.bf16 %v418_v7, %v416_v6  ;;  %v415_v10 = vld [vmem:[%s266_s30 + $0x20] sm:$0xff]  ;;  %v417_v11 = vld [vmem:[%s266_s30 + $0x30] sm:$0xff]  ;;  %v420_v12 = vld [vmem:[%s266_s30 + $0x48] sm:$0xff]  ;;  %p2632_p12 = scmp.ne.s32.totalorder %s3684_s23, %s2631_s29 }
  0x1f   : > { %2221 = vmatprep.subr.bf16.mxu0 %v2220_v4  ;;  %v422_v13 = vld [vmem:[%s266_s30 + $0x58] sm:$0xff]  ;;  %v2226_v14 = vpack.c.bf16 %v417_v11, %v415_v10  ;;  %v419_v16 = vld [vmem:[%s266_s30 + $0x40] sm:$0xff]  ;;  %v421_v17 = vld [vmem:[%s266_s30 + $0x50] sm:$0xff] }
  0x20   : > { %2223 = vmatpush1.bf16.msra.mxu0 %v2222_v8  ;;  %v2228_v15 = vpack.c.bf16 %v422_v13, %v420_v12  ;;  %v424_v18 = vld [vmem:[%s266_s30 + $0x68] sm:$0xff]  ;;  %v426_v19 = vld [vmem:[%s266_s30 + $0x78] sm:$0xff]  ;;  %v2230_v20 = vpack.c.bf16 %v421_v17, %v419_v16  ;;  %v423_v22 = vld [vmem:[%s266_s30 + $0x60] sm:$0xff]  ;;  %p2633_p13 = pnand %p2632_p12, %p2776_p4 }
  0x21   : > { %2225 = vmatprep.subr.bf16.mxu0 %v2224_v9  ;;  %v2232_v21 = vpack.c.bf16 %v426_v19, %v424_v18  ;;  %v425_v23 = vld [vmem:[%s266_s30 + $0x70] sm:$0xff]  ;;  %v379_v25 = vld [vmem:[%s2806_s7] sm:$0xff]  ;;  %v380_v26 = vld [vmem:[%s2806_s7 + $0x8] sm:$0xff]  ;;  %s2713_s30 = smov [#allocation5]  }
  0x22   : > { %v2234_v24 = vpack.c.bf16 %v425_v23, %v423_v22  ;;  %v381_v27 = vld [vmem:[%s2806_s7 + $0x10] sm:$0xff]  ;;  %v382_v28 = vld [vmem:[%s2806_s7 + $0x18] sm:$0xff]  ;;  %v383_v29 = vld [vmem:[%s2806_s7 + $0x20] sm:$0xff]  ;;  %p2634_p0 = pneg %p2633_p13  ;;  %s2635_s4 = sshll.u32 %s2713_s30, 4  ;;  %s2636_s4 = int_to_ptr.vmem [resolvable:$false] %s2635_s4 }
  0x23   : > { %v384_v30 = vld [vmem:[%s2806_s7 + $0x28] sm:$0xff]  ;;  %v385_v31 = vld [vmem:[%s2806_s7 + $0x30] sm:$0xff]  ;;  %v386_v32 = vld [vmem:[%s2806_s7 + $0x38] sm:$0xff]  ;;  %s2637_s5 = scalar_lea.vmem %s2636_s4, 8192  ;;  %p2638_p1 = scmp.lt.s32.totalorder %s3684_s23, %s2636_s4 }
  0x24   : > { %2227 = vmatpush1.bf16.msra.mxu0 %v2226_v14  ;;  %v387_v33 = vld [vmem:[%s2806_s7 + $0x40] sm:$0xff]  ;;  %v388_v34 = vld [vmem:[%s2806_s7 + $0x48] sm:$0xff]  ;;  %v389_v35 = vld [vmem:[%s2806_s7 + $0x50] sm:$0xff]  ;;  %p2639_p2 = scmp.lt.s32.totalorder %s2637_s5, %s2631_s29 }
  0x25   : > { %2229 = vmatprep.subr.bf16.mxu0 %v2228_v15  ;;  %v390_v36 = vld [vmem:[%s2806_s7 + $0x58] sm:$0xff]  ;;  %v391_v37 = vld [vmem:[%s2806_s7 + $0x60] sm:$0xff]  ;;  %v392_v38 = vld [vmem:[%s2806_s7 + $0x68] sm:$0xff] }
  0x26   : > { %v393_v39 = vld [vmem:[%s2806_s7 + $0x70] sm:$0xff]  ;;  %v394_v40 = vld [vmem:[%s2806_s7 + $0x78] sm:$0xff]  ;;  %v395_v41 = vld [vmem:[%s2806_s7 + $0x80] sm:$0xff]  ;;  %p2640_p3 = por %p2639_p2, %p2638_p1 }
  0x27   : > { %v396_v42 = vld [vmem:[%s2806_s7 + $0x88] sm:$0xff]  ;;  %v397_v43 = vld [vmem:[%s2806_s7 + $0x90] sm:$0xff]  ;;  %v398_v44 = vld [vmem:[%s2806_s7 + $0x98] sm:$0xff] }
  0x28   : > { %2231 = vmatpush1.bf16.msra.mxu0 %v2230_v20  ;;  %v399_v45 = vld [vmem:[%s2806_s7 + $0xa0] sm:$0xff]  ;;  %v400_v46 = vld [vmem:[%s2806_s7 + $0xa8] sm:$0xff]  ;;  %v401_v47 = vld [vmem:[%s2806_s7 + $0xb0] sm:$0xff]  ;;  %p2641_p5 = pnand %p2640_p3, %p2634_p0 }
  0x29   : > { %2233 = vmatprep.subr.bf16.mxu0 %v2232_v21  ;;  %v402_v48 = vld [vmem:[%s2806_s7 + $0xb8] sm:$0xff]  ;;  %v403_v49 = vld [vmem:[%s2806_s7 + $0xc0] sm:$0xff]  ;;  %v404_v50 = vld [vmem:[%s2806_s7 + $0xc8] sm:$0xff] }
  0x2a   : > { %v405_v51 = vld [vmem:[%s2806_s7 + $0xd0] sm:$0xff]  ;;  %v406_v52 = vld [vmem:[%s2806_s7 + $0xd8] sm:$0xff]  ;;  %v407_v53 = vld [vmem:[%s2806_s7 + $0xe0] sm:$0xff] }
  0x2b   : > { %v408_v54 = vld [vmem:[%s2806_s7 + $0xe8] sm:$0xff]  ;;  %v409_v55 = vld [vmem:[%s2806_s7 + $0xf0] sm:$0xff]  ;;  %v410_v56 = vld [vmem:[%s2806_s7 + $0xf8] sm:$0xff] }
  0x2c   : > { %2235 = vmatpush1.bf16.msra.mxu0 %v2234_v24  ;;  %v1517_v58 = vld [vmem:[%s2908_s10] sm:$0xff]  ;;  %v1518_v59 = vld [vmem:[%s2908_s10 + $0x8] sm:$0xff]  ;;  %v1519_v61 = vld [vmem:[%s2908_s10 + $0x10] sm:$0xff] }
  0x2d   : > { %2236 = vmatprep.subr.bf16.mxu0 %v2712_v57  ;;  %v2237_v60 = vpack.c.bf16 %v1518_v59, %v1517_v58  ;;  %v1520_v62 = vld [vmem:[%s2908_s10 + $0x18] sm:$0xff]  ;;  %v1521_v1 = vld [vmem:[%s2908_s10 + $0x20] sm:$0xff]  ;;  %v1522_v2 = vld [vmem:[%s2908_s10 + $0x28] sm:$0xff] }
  0x2e   : > { %v2240_v63 = vpack.c.bf16 %v1520_v62, %v1519_v61  ;;  %v2243_v4 = vpack.c.bf16 %v1522_v2, %v1521_v1  ;;  %v1523_v6 = vld [vmem:[%s2908_s10 + $0x30] sm:$0xff]  ;;  %v1524_v7 = vld [vmem:[%s2908_s10 + $0x38] sm:$0xff]  ;;  %v1525_v12 = vld [vmem:[%s2908_s10 + $0x40] sm:$0xff] }
  0x2f   : > { %2179 = vmatmul.mubr.msk.f32.vlgmr.msra.gmra.mrb[0].mxu0 %vm427_vm0, %v379_v25  ;;  %2300 = vmatpush1.bf16.msra.mxu1 %v2237_v60  ;;  %v2246_v10 = vpack.c.bf16 %v1524_v7, %v1523_v6  ;;  %v1526_v13 = vld [vmem:[%s2908_s10 + $0x48] sm:$0xff]  ;;  %v1527_v18 = vld [vmem:[%s2908_s10 + $0x50] sm:$0xff]  ;;  %v1528_v19 = vld [vmem:[%s2908_s10 + $0x58] sm:$0xff] }
  0x30   : > { %594 = vmatprep.mubr.f32.mxu0 %v2711_v0  ;;  %2238 = vmatpush1.bf16.msra.mxu0 %v2237_v60  ;;  %v2249_v16 = vpack.c.bf16 %v1526_v13, %v1525_v12  ;;  %v2252_v22 = vpack.c.bf16 %v1528_v19, %v1527_v18  ;;  %v1529_v24 = vld [vmem:[%s2908_s10 + $0x60] sm:$0xff]  ;;  %v1530_v25 = vld [vmem:[%s2908_s10 + $0x68] sm:$0xff]  ;;  %v1543_v13 = vld [vmem:[%s2908_s10 + $0xd0] sm:$0xff] }
  0x31   : > { %2285 = vmatprep.subr.bf16.mxu1 %v2712_v57  ;;  %2239 = vmatprep.subr.bf16.mxu0 %v2712_v57  ;;  %v1541_v1 = vld [vmem:[%s2908_s10 + $0xc0] sm:$0xff]  ;;  %v1542_v2 = vld [vmem:[%s2908_s10 + $0xc8] sm:$0xff] }
  0x32   : > { %v2273_v6 = vpack.c.bf16 %v1542_v2, %v1541_v1 }
  0x33   : > { %2180 = vmatmul.mubr.msk.f32.gmra.mrb[2].mxu0 %vm427_vm0, %v380_v26  ;;  %2301 = vmatpush1.bf16.msra.mxu1 %v2240_v63 }
  0x34   : > { %600 = vmatprep.mubr.f32.mxu0 %v2711_v0  ;;  %2241 = vmatpush1.bf16.msra.mxu0 %v2240_v63 }
  0x35   : > { %2286 = vmatprep.subr.bf16.mxu1 %v2712_v57  ;;  %2242 = vmatprep.subr.bf16.mxu0 %v2712_v57 }
  0x37   : > { %2181 = vmatmul.mubr.msk.f32.gmra.mrb[4].mxu0 %vm427_vm0, %v381_v27  ;;  %2302 = vmatpush1.bf16.msra.mxu1 %v2243_v4 }
  0x38   : > { %606 = vmatprep.mubr.f32.mxu0 %v2711_v0  ;;  %2244 = vmatpush1.bf16.msra.mxu0 %v2243_v4 }
  0x39   : > { %2287 = vmatprep.subr.bf16.mxu1 %v2712_v57  ;;  %2245 = vmatprep.subr.bf16.mxu0 %v2712_v57 }
  0x3b   : > { %2182 = vmatmul.mubr.msk.f32.gmra.mrb[6].mxu0 %vm427_vm0, %v382_v28  ;;  %2303 = vmatpush1.bf16.msra.mxu1 %v2246_v10  ;;  %v2255_v28 = vpack.c.bf16 %v1530_v25, %v1529_v24  ;;  %v1545_v25 = vld [vmem:[%s2908_s10 + $0xe0] sm:$0xff] }
  0x3c   : > { %612 = vmatprep.mubr.f32.mxu0 %v2711_v0  ;;  %2247 = vmatpush1.bf16.msra.mxu0 %v2246_v10 }
  0x3d   : > { %2288 = vmatprep.subr.bf16.mxu1 %v2712_v57  ;;  %2248 = vmatprep.subr.bf16.mxu0 %v2712_v57 }
  0x3f   : > { %2183 = vmatmul.mubr.msk.f32.gmra.mrb[8].mxu0 %vm427_vm0, %v383_v29  ;;  %2304 = vmatpush1.bf16.msra.mxu1 %v2249_v16 }
  0x40   : > { %618 = vmatprep.mubr.f32.mxu0 %v2711_v0  ;;  %2250 = vmatpush1.bf16.msra.mxu0 %v2249_v16  ;;  %v1544_v16 = vld [vmem:[%s2908_s10 + $0xd8] sm:$0xff] }
  0x41   : > { %2289 = vmatprep.subr.bf16.mxu1 %v2712_v57  ;;  %2251 = vmatprep.subr.bf16.mxu0 %v2712_v57  ;;  %v2276_v19 = vpack.c.bf16 %v1544_v16, %v1543_v13 }
  0x43   : > { %2184 = vmatmul.mubr.msk.f32.gmra.mrb[10].mxu0 %vm427_vm0, %v384_v30  ;;  %2305 = vmatpush1.bf16.msra.mxu1 %v2252_v22  ;;  %v1531_v30 = vld [vmem:[%s2908_s10 + $0x70] sm:$0xff] }
  0x44   : > { %624 = vmatprep.mubr.f32.mxu0 %v2711_v0  ;;  %2253 = vmatpush1.bf16.msra.mxu0 %v2252_v22 }
  0x45   : > { %2290 = vmatprep.subr.bf16.mxu1 %v2712_v57  ;;  %2254 = vmatprep.subr.bf16.mxu0 %v2712_v57 }
  0x47   : > { %2185 = vmatmul.mubr.msk.f32.gmra.mrb[12].mxu0 %vm427_vm0, %v385_v31  ;;  %v1532_v31 = vld [vmem:[%s2908_s10 + $0x78] sm:$0xff]  ;;  %2306 = vmatpush1.bf16.msra.mxu1 %v2255_v28 }
  0x48   : > { %630 = vmatprep.mubr.f32.mxu0 %v2711_v0  ;;  %2256 = vmatpush1.bf16.msra.mxu0 %v2255_v28  ;;  %v1546_v28 = vld [vmem:[%s2908_s10 + $0xe8] sm:$0xff] }
  0x49   : > { %2291 = vmatprep.subr.bf16.mxu1 %v2712_v57  ;;  %2257 = vmatprep.subr.bf16.mxu0 %v2712_v57 }
  0x4b   : > { %2186 = vmatmul.mubr.msk.f32.gmra.mrb[14].mxu0 %vm427_vm0, %v386_v32 }
  0x4c   : > { %636 = vmatprep.mubr.f32.mxu0 %v2711_v0 }
  0x4f   : > { %2187 = vmatmul.mubr.msk.f32.gmra.mrb[16].mxu0 %vm427_vm0, %v387_v33 }
  0x50   : > { %642 = vmatprep.mubr.f32.mxu0 %v2711_v0 }
  0x53   : > { %2188 = vmatmul.mubr.msk.f32.gmra.mrb[18].mxu0 %vm427_vm0, %v388_v34  ;;  %v2258_v34 = vpack.c.bf16 %v1532_v31, %v1531_v30  ;;  %v2279_v31 = vpack.c.bf16 %v1546_v28, %v1545_v25 }
  0x54   : > { %648 = vmatprep.mubr.f32.mxu0 %v2711_v0 }
  0x55   : > { %2307 = vmatpush1.bf16.msra.mxu1 %v2258_v34  ;;  %2259 = vmatpush1.bf16.msra.mxu0 %v2258_v34 }
  0x56   : > { %2292 = vmatprep.subr.bf16.mxu1 %v2712_v57  ;;  %2260 = vmatprep.subr.bf16.mxu0 %v2712_v57 }
  0x57   : > { %2189 = vmatmul.mubr.msk.f32.gmra.mrb[20].mxu0 %vm427_vm0, %v389_v35 }
  0x58   : > { %654 = vmatprep.mubr.f32.mxu0 %v2711_v0 }
  0x5b   : > { %2190 = vmatmul.mubr.msk.f32.gmra.mrb[22].mxu0 %vm427_vm0, %v390_v36  ;;  %v1533_v36 = vld [vmem:[%s2908_s10 + $0x80] sm:$0xff] }
  0x5c   : > { %660 = vmatprep.mubr.f32.mxu0 %v2711_v0 }
  0x5f   : > { %2191 = vmatmul.mubr.msk.f32.gmra.mrb[24].mxu0 %vm427_vm0, %v391_v37  ;;  %v1534_v37 = vld [vmem:[%s2908_s10 + $0x88] sm:$0xff] }
  0x60   : > { %666 = vmatprep.mubr.f32.mxu0 %v2711_v0 }
  0x63   : > { %2192 = vmatmul.mubr.msk.f32.gmra.mrb[26].mxu0 %vm427_vm0, %v392_v38 }
  0x64   : > { %672 = vmatprep.mubr.f32.mxu0 %v2711_v0 }
  0x67   : > { %2193 = vmatmul.mubr.msk.f32.gmra.mrb[28].mxu0 %vm427_vm0, %v393_v39 }
  0x68   : > { %678 = vmatprep.mubr.f32.mxu0 %v2711_v0 }
  0x6b   : > { %2194 = vmatmul.mubr.msk.f32.gmra.mrb[30].mxu0 %vm427_vm0, %v394_v40  ;;  %v2261_v40 = vpack.c.bf16 %v1534_v37, %v1533_v36  ;;  %v1547_v37 = vld [vmem:[%s2908_s10 + $0xf0] sm:$0xff] }
  0x6c   : > { %684 = vmatprep.mubr.f32.mxu0 %v2711_v0 }
  0x6d   : > { %2308 = vmatpush1.bf16.msra.mxu1 %v2261_v40  ;;  %2262 = vmatpush1.bf16.msra.mxu0 %v2261_v40  ;;  %v1548_v40 = vld [vmem:[%s2908_s10 + $0xf8] sm:$0xff] }
  0x6e   : > { %2293 = vmatprep.subr.bf16.mxu1 %v2712_v57  ;;  %2263 = vmatprep.subr.bf16.mxu0 %v2712_v57 }
  0x6f   : > { %2195 = vmatmul.mubr.msk.f32.gmra.mrb[32].mxu0 %vm427_vm0, %v395_v41 }
  0x70   : > { %690 = vmatprep.mubr.f32.mxu0 %v2711_v0 }
  0x73   : > { %2196 = vmatmul.mubr.msk.f32.gmra.mrb[34].mxu0 %vm427_vm0, %v396_v42  ;;  %v1535_v42 = vld [vmem:[%s2908_s10 + $0x90] sm:$0xff] }
  0x74   : > { %696 = vmatprep.mubr.f32.mxu0 %v2711_v0 }
  0x77   : > { %2197 = vmatmul.mubr.msk.f32.gmra.mrb[36].mxu0 %vm427_vm0, %v397_v43  ;;  %v1536_v43 = vld [vmem:[%s2908_s10 + $0x98] sm:$0xff] }
  0x78   : > { %702 = vmatprep.mubr.f32.mxu0 %v2711_v0 }
  0x7b   : > { %2198 = vmatmul.mubr.msk.f32.gmra.mrb[38].mxu0 %vm427_vm0, %v398_v44 }
  0x7c   : > { %708 = vmatprep.mubr.f32.mxu0 %v2711_v0 }
  0x7f   : > { %2199 = vmatmul.mubr.msk.f32.gmra.mrb[40].mxu0 %vm427_vm0, %v399_v45 }
  0x80   : > { %714 = vmatprep.mubr.f32.mxu0 %v2711_v0 }
  0x83   : > { %2200 = vmatmul.mubr.msk.f32.gmra.mrb[42].mxu0 %vm427_vm0, %v400_v46  ;;  %v2264_v46 = vpack.c.bf16 %v1536_v43, %v1535_v42  ;;  %v2282_v42 = vpack.c.bf16 %v1548_v40, %v1547_v37 }
  0x84   : > { %720 = vmatprep.mubr.f32.mxu0 %v2711_v0 }
  0x85   : > { %2309 = vmatpush1.bf16.msra.mxu1 %v2264_v46  ;;  %2265 = vmatpush1.bf16.msra.mxu0 %v2264_v46 }
  0x86   : > { %2294 = vmatprep.subr.bf16.mxu1 %v2712_v57  ;;  %2266 = vmatprep.subr.bf16.mxu0 %v2712_v57 }
  0x87   : > { %2201 = vmatmul.mubr.msk.f32.gmra.mrb[44].mxu0 %vm427_vm0, %v401_v47 }
  0x88   : > { %726 = vmatprep.mubr.f32.mxu0 %v2711_v0 }
  0x8b   : > { %2202 = vmatmul.mubr.msk.f32.gmra.mrb[46].mxu0 %vm427_vm0, %v402_v48  ;;  %v1537_v48 = vld [vmem:[%s2908_s10 + $0xa0] sm:$0xff] }
  0x8c   : > { %732 = vmatprep.mubr.f32.mxu0 %v2711_v0 }
  0x8f   : > { %2203 = vmatmul.mubr.msk.f32.gmra.mrb[48].mxu0 %vm427_vm0, %v403_v49  ;;  %v1538_v49 = vld [vmem:[%s2908_s10 + $0xa8] sm:$0xff] }
  0x90   : > { %738 = vmatprep.mubr.f32.mxu0 %v2711_v0 }
  0x93   : > { %2204 = vmatmul.mubr.msk.f32.gmra.mrb[50].mxu0 %vm427_vm0, %v404_v50 }
  0x94   : > { %744 = vmatprep.mubr.f32.mxu0 %v2711_v0 }
  0x97   : > { %2205 = vmatmul.mubr.msk.f32.gmra.mrb[52].mxu0 %vm427_vm0, %v405_v51 }
  0x98   : > { %750 = vmatprep.mubr.f32.mxu0 %v2711_v0 }
  0x9b   : > { %2206 = vmatmul.mubr.msk.f32.gmra.mrb[54].mxu0 %vm427_vm0, %v406_v52  ;;  %v2267_v52 = vpack.c.bf16 %v1538_v49, %v1537_v48 }
  0x9c   : > { %756 = vmatprep.mubr.f32.mxu0 %v2711_v0 }
  0x9d   : > { %2310 = vmatpush1.bf16.msra.mxu1 %v2267_v52  ;;  %2268 = vmatpush1.bf16.msra.mxu0 %v2267_v52 }
  0x9e   : > { %2295 = vmatprep.subr.bf16.mxu1 %v2712_v57  ;;  %2269 = vmatprep.subr.bf16.mxu0 %v2712_v57 }
  0x9f   : > { %2207 = vmatmul.mubr.msk.f32.gmra.mrb[56].mxu0 %vm427_vm0, %v407_v53 }
  0xa0   : > { %762 = vmatprep.mubr.f32.mxu0 %v2711_v0 }
  0xa3   : > { %2208 = vmatmul.mubr.msk.f32.gmra.mrb[58].mxu0 %vm427_vm0, %v408_v54  ;;  %v1539_v54 = vld [vmem:[%s2908_s10 + $0xb0] sm:$0xff] }
  0xa4   : > { %768 = vmatprep.mubr.f32.mxu0 %v2711_v0 }
  0xa7   : > { %2209 = vmatmul.mubr.msk.f32.gmra.mrb[60].mxu0 %vm427_vm0, %v409_v55  ;;  %v1540_v55 = vld [vmem:[%s2908_s10 + $0xb8] sm:$0xff] }
  0xa8   : > { %774 = vmatprep.mubr.f32.mxu0 %v2711_v0  ;;  %v2270_v59 = vpack.c.bf16 %v1540_v55, %v1539_v54 }
  0xaa   : > { %2311 = vmatpush1.bf16.msra.mxu1 %v2270_v59  ;;  %2271 = vmatpush1.bf16.msra.mxu0 %v2270_v59 }
  0xab   : > { %2210 = vmatmul.mubr.msk.f32.gmra.mrb[62].mxu0 %vm427_vm0, %v410_v56  ;;  %2296 = vmatprep.subr.bf16.mxu1 %v2712_v57 }
  0xac   : > { %2272 = vmatprep.subr.bf16.mxu0 %v2712_v57 }
  0xae   : > { %2312 = vmatpush1.bf16.msra.mxu1 %v2273_v6  ;;  %2274 = vmatpush1.bf16.msra.mxu0 %v2273_v6 }
  0xaf   : > { %2297 = vmatprep.subr.bf16.mxu1 %v2712_v57  ;;  %2275 = vmatprep.subr.bf16.mxu0 %v2712_v57 }
  0xb2   : > { %2313 = vmatpush1.bf16.msra.mxu1 %v2276_v19  ;;  %2277 = vmatpush1.bf16.msra.mxu0 %v2276_v19 }
  0xb3   : > { %2298 = vmatprep.subr.bf16.mxu1 %v2712_v57  ;;  %2278 = vmatprep.subr.bf16.mxu0 %v2712_v57 }
  0xb6   : > { %2314 = vmatpush1.bf16.msra.mxu1 %v2279_v31  ;;  %2280 = vmatpush1.bf16.msra.mxu0 %v2279_v31 }
  0xb7   : > { %2299 = vmatprep.subr.bf16.mxu1 %v2712_v57  ;;  %2281 = vmatprep.subr.bf16.mxu0 %v2712_v57 }
  0xba   : > { %2315 = vmatpush1.bf16.msra.mxu1 %v2282_v42  ;;  %2283 = vmatpush1.bf16.msra.mxu0 %v2282_v42 }
 0x102   : > { %v2918_v0 = vpop.f32.mrb[0].mxu0 }
 0x103   : > { %v2922_v3 = vpop.f32.mrb[1].mxu0 }
 0x104   : > { %v845_v5 = vmax.f32 %v2918_v0, %v2922_v3 }
 0x106   : > { %v2930_v8 = vpop.f32.mrb[2].mxu0 }
 0x107   : > { %v2932_v9 = vpop.f32.mrb[3].mxu0 }
 0x108   : > { %v848_v11 = vmax.f32 %v2930_v8, %v2932_v9 }
 0x10a   : > { %v2940_v14 = vpop.f32.mrb[4].mxu0 }
 0x10b   : > { %v2942_v15 = vpop.f32.mrb[5].mxu0 }
 0x10c   : > { %v851_v17 = vmax.f32 %v2940_v14, %v2942_v15 }
 0x10e   : > { %v2950_v20 = vpop.f32.mrb[6].mxu0 }
 0x10f   : > { %v2952_v21 = vpop.f32.mrb[7].mxu0 }
 0x110   : > { %v854_v23 = vmax.f32 %v2950_v20, %v2952_v21 }
 0x112   : > { %v2960_v26 = vpop.f32.mrb[8].mxu0 }
 0x113   : > { %v2962_v27 = vpop.f32.mrb[9].mxu0 }
 0x114   : > { %3766 = vst [vmem:[#allocation8_spill] sm:$0xff] %v2962_v27 }
 0x116   : > { %v2970_v32 = vpop.f32.mrb[10].mxu0 }
 0x117   : > { %3767 = vst [vmem:[#allocation9_spill] sm:$0xff] %v2970_v32  ;;  %v2972_v33 = vpop.f32.mrb[11].mxu0 }
 0x118   : > { %3768 = vst [vmem:[#allocation10_spill] sm:$0xff] %v2972_v33 }
 0x11a   : > { %v2980_v38 = vpop.f32.mrb[12].mxu0 }
 0x11b   : > { %v2982_v39 = vpop.f32.mrb[13].mxu0 }
 0x11c   : > { %v863_v41 = vmax.f32 %v2980_v38, %v2982_v39 }
 0x11e   : > { %864 = vmax.xlane.f32.xlu0 %v863_v41  ;;  %v2990_v44 = vpop.f32.mrb[14].mxu0 }
 0x11f   : > { %v2992_v45 = vpop.f32.mrb[15].mxu0 }
 0x120   : > { %v866_v47 = vmax.f32 %v2990_v44, %v2992_v45 }
 0x122   : > { %867 = vmax.xlane.f32.xlu0 %v866_v47  ;;  %v3000_v50 = vpop.f32.mrb[16].mxu0 }
 0x123   : > { %v3002_v51 = vpop.f32.mrb[17].mxu0 }
 0x124   : > { %v869_v53 = vmax.f32 %v3000_v50, %v3002_v51 }
 0x126   : > { %870 = vmax.xlane.f32.xlu1 %v869_v53  ;;  %v3010_v56 = vpop.f32.mrb[18].mxu0 }
 0x127   : > { %v3012_v58 = vpop.f32.mrb[19].mxu0 }
 0x128   : > { %v872_v60 = vmax.f32 %v3010_v56, %v3012_v58 }
 0x12a   : > { %873 = vmax.xlane.f32.xlu1 %v872_v60  ;;  %v3018_v61 = vpop.f32.mrb[20].mxu0 }
 0x12b   : > { %v3020_v62 = vpop.f32.mrb[21].mxu0 }
 0x12c   : > { %v875_v63 = vmax.f32 %v3018_v61, %v3020_v62 }
 0x12e   : > { %876 = vmax.xlane.f32.xlu0 %v875_v63  ;;  %v3028_v4 = vpop.f32.mrb[22].mxu0 }
 0x12f   : > { %v3030_v7 = vpop.f32.mrb[23].mxu0 }
 0x130   : > { %v878_v10 = vmax.f32 %v3028_v4, %v3030_v7 }
 0x132   : > { %879 = vmax.xlane.f32.xlu1 %v878_v10  ;;  %v3036_v12 = vpop.f32.mrb[24].mxu0 }
 0x133   : > { %v3040_v18 = vpop.f32.mrb[25].mxu0 }
 0x134   : > { %v881_v22 = vmax.f32 %v3036_v12, %v3040_v18 }
 0x136   : > { %882 = vmax.xlane.f32.xlu0 %v881_v22  ;;  %v3044_v24 = vpop.f32.mrb[26].mxu0 }
 0x137   : > { %v3049_v30 = vpop.f32.mrb[27].mxu0 }
 0x138   : > { %v884_v34 = vmax.f32 %v3044_v24, %v3049_v30 }
 0x13a   : > { %885 = vmax.xlane.f32.xlu1 %v884_v34  ;;  %v3054_v36 = vpop.f32.mrb[28].mxu0 }
 0x13b   : > { %v3059_v41 = vpop.f32.mrb[29].mxu0 }
 0x13c   : > { %v887_v43 = vmax.f32 %v3054_v36, %v3059_v41 }
 0x13e   : > { %888 = vmax.xlane.f32.xlu0 %v887_v43  ;;  %v3064_v46 = vpop.f32.mrb[30].mxu0 }
 0x13f   : > { %v3066_v47 = vpop.f32.mrb[31].mxu0 }
 0x140   : > { %v890_v48 = vmax.f32 %v3064_v46, %v3066_v47 }
 0x142   : > { %891 = vmax.xlane.f32.xlu1 %v890_v48  ;;  %v3070_v49 = vpop.f32.mrb[32].mxu0 }
 0x143   : > { %v3072_v52 = vpop.f32.mrb[33].mxu0 }
 0x144   : > { %v893_v57 = vmax.f32 %v3070_v49, %v3072_v52 }
 0x146   : > { %894 = vmax.xlane.f32.xlu0 %v893_v57  ;;  %v3076_v53 = vpop.f32.mrb[34].mxu0 }
 0x147   : > { %v3078_v54 = vpop.f32.mrb[35].mxu0 }
 0x148   : > { %v896_v55 = vmax.f32 %v3076_v53, %v3078_v54 }
 0x14a   : > { %897 = vmax.xlane.f32.xlu1 %v896_v55  ;;  %v3082_v59 = vpop.f32.mrb[36].mxu0 }
 0x14b   : > { %v3084_v60 = vpop.f32.mrb[37].mxu0 }
 0x14c   : > { %v899_v63 = vmax.f32 %v3082_v59, %v3084_v60 }
 0x14e   : > { %900 = vmax.xlane.f32.xlu0 %v899_v63  ;;  %v3088_v1 = vpop.f32.mrb[38].mxu0 }
 0x14f   : > { %v3090_v2 = vpop.f32.mrb[39].mxu0 }
 0x150   : > { %v902_v6 = vmax.f32 %v3088_v1, %v3090_v2 }
 0x152   : > { %903 = vmax.xlane.f32.xlu1 %v902_v6  ;;  %v3094_v10 = vpop.f32.mrb[40].mxu0 }
 0x153   : > { %v3096_v13 = vpop.f32.mrb[41].mxu0 }
 0x154   : > { %v905_v16 = vmax.f32 %v3094_v10, %v3096_v13 }
 0x156   : > { %906 = vmax.xlane.f32.xlu0 %v905_v16  ;;  %v3100_v19 = vpop.f32.mrb[42].mxu0 }
 0x157   : > { %v3102_v22 = vpop.f32.mrb[43].mxu0 }
 0x158   : > { %v908_v25 = vmax.f32 %v3100_v19, %v3102_v22 }
 0x15a   : > { %909 = vmax.xlane.f32.xlu1 %v908_v25  ;;  %v3106_v28 = vpop.f32.mrb[44].mxu0 }
 0x15b   : > { %v3108_v31 = vpop.f32.mrb[45].mxu0 }
 0x15c   : > { %v911_v34 = vmax.f32 %v3106_v28, %v3108_v31 }
 0x15e   : > { %912 = vmax.xlane.f32.xlu0 %v911_v34  ;;  %v3112_v37 = vpop.f32.mrb[46].mxu0 }
 0x15f   : > { %v3114_v40 = vpop.f32.mrb[47].mxu0 }
 0x160   : > { %v914_v42 = vmax.f32 %v3112_v37, %v3114_v40 }
 0x162   : > { %915 = vmax.xlane.f32.xlu1 %v914_v42  ;;  %v3118_v43 = vpop.f32.mrb[48].mxu0 }
 0x163   : > { %v3120_v48 = vpop.f32.mrb[49].mxu0 }
 0x164   : > { %v917_v57 = vmax.f32 %v3118_v43, %v3120_v48 }
 0x166   : > { %918 = vmax.xlane.f32.xlu0 %v917_v57  ;;  %v3124_v55 = vpop.f32.mrb[50].mxu0 }
 0x167   : > { %v3126_v63 = vpop.f32.mrb[51].mxu0 }
 0x168   : > { %v920_v6 = vmax.f32 %v3124_v55, %v3126_v63 }
 0x16a   : > { %846 = vmax.xlane.f32.xlu0 %v845_v5  ;;  %921 = vmax.xlane.f32.xlu1 %v920_v6  ;;  %v3133_v16 = vpop.f32.mrb[52].mxu0 }
 0x16b   : > { %v3135_v25 = vpop.f32.mrb[53].mxu0 }
 0x16c   : > { %v923_v34 = vmax.f32 %v3133_v16, %v3135_v25 }
 0x16e   : > { %849 = vmax.xlane.f32.xlu0 %v848_v11  ;;  %924 = vmax.xlane.f32.xlu1 %v923_v34  ;;  %v3142_v42 = vpop.f32.mrb[54].mxu0 }
 0x16f   : > { %v3144_v57 = vpop.f32.mrb[55].mxu0 }
 0x170   : > { %3769 = vst [vmem:[#allocation11_spill] sm:$0xff] %v3144_v57  ;;  %v926_v5 = vmax.f32 %v3142_v42, %v3144_v57 }
 0x172   : > { %852 = vmax.xlane.f32.xlu0 %v851_v17  ;;  %927 = vmax.xlane.f32.xlu1 %v926_v5  ;;  %v3151_v6 = vpop.f32.mrb[56].mxu0  ;;  %v3774_v5 = vmax.f32 %v2960_v26, %v2962_v27 }
 0x173   : > { %3770 = vst [vmem:[#allocation12_spill] sm:$0xff] %v3151_v6  ;;  %v3153_v35 = vpop.f32.mrb[57].mxu0 }
 0x174   : > { %3771 = vst [vmem:[#allocation13_spill] sm:$0xff] %v3153_v35  ;;  %v929_v11 = vmax.f32 %v3151_v6, %v3153_v35 }
 0x176   : > { %855 = vmax.xlane.f32.xlu0 %v854_v23  ;;  %930 = vmax.xlane.f32.xlu1 %v929_v11  ;;  %v3160_v34 = vpop.f32.mrb[58].mxu0  ;;  %v3777_v11 = vmax.f32 %v2970_v32, %v2972_v33 }
 0x177   : > { %3772 = vst [vmem:[#allocation14_spill] sm:$0xff] %v3160_v34  ;;  %v3162_v29 = vpop.f32.mrb[59].mxu0 }
 0x178   : > { %3773 = vst [vmem:[#allocation15_spill] sm:$0xff] %v3162_v29  ;;  %v932_v17 = vmax.f32 %v3160_v34, %v3162_v29 }
 0x17a   : > { %858 = vmax.xlane.f32.xlu0 %v3774_v5  ;;  %933 = vmax.xlane.f32.xlu1 %v932_v17  ;;  %v3169_v57 = vpop.f32.mrb[60].mxu0 }
 0x17b   : > { %3775 = vst [vmem:[#allocation16_spill] sm:$0xff] %v3169_v57  ;;  %v3171_v35 = vpop.f32.mrb[61].mxu0 }
 0x17c   : > { %3776 = vst [vmem:[#allocation17_spill] sm:$0xff] %v3171_v35  ;;  %v935_v23 = vmax.f32 %v3169_v57, %v3171_v35 }
 0x17e   : > { %861 = vmax.xlane.f32.xlu0 %v3777_v11  ;;  %936 = vmax.xlane.f32.xlu1 %v935_v23  ;;  %v3178_v6 = vpop.f32.mrb[62].mxu0 }
 0x17f   : > { %3778 = vst [vmem:[#allocation18_spill] sm:$0xff] %v3178_v6  ;;  %v3180_v29 = vpop.f32.mrb[63].mxu0 }
 0x180   : > { %3779 = vst [vmem:[#allocation19_spill] sm:$0xff] %v3180_v29  ;;  %v938_v5 = vmax.f32 %v3178_v6, %v3180_v29 }
 0x182   : > { %939 = vmax.xlane.f32.xlu1 %v938_v5 }
 0x1ab   : > { %v865_v17 = vpop.xlane.xlu0 %864 }
 0x1ac   : > { %v3184_v34 = vmax.f32 %v865_v17, -2.3819763e+38 }
 0x1ae   : > { %v1081_v27 = vsub.f32 %v2980_v38, %v3184_v34  ;;  %v1082_v35 = vsub.f32 %v2982_v39, %v3184_v34 }
 0x1af   : > { %v868_v57 = vpop.xlane.xlu0 %867 }
 0x1b0   : > { %v1157_v11 = vmul.f32 1.442695, %v1081_v27  ;;  %v1159_v23 = vmul.f32 1.442695, %v1082_v35  ;;  %v3190_v33 = vmax.f32 %v868_v57, -2.3819763e+38 }
 0x1b2   : > { %2375 = vpow2.f32 %v1157_v11  ;;  %v1083_v29 = vsub.f32 %v2990_v44, %v3190_v33  ;;  %v1084_v5 = vsub.f32 %v2992_v45, %v3190_v33 }
 0x1b3   : > { %2377 = vpow2.f32 %v1159_v23  ;;  %v871_v17 = vpop.xlane.xlu1 %870 }
 0x1b4   : > { %v3196_v6 = vmax.f32 %v871_v17, -2.3819763e+38  ;;  %v1161_v38 = vmul.f32 1.442695, %v1083_v29  ;;  %v1163_v32 = vmul.f32 1.442695, %v1084_v5 }
 0x1b6   : > { %v1085_v39 = vsub.f32 %v3000_v50, %v3196_v6  ;;  %v1086_v27 = vsub.f32 %v3002_v51, %v3196_v6  ;;  %2379 = vpow2.f32 %v1161_v38 }
 0x1b7   : > { %v874_v35 = vpop.xlane.xlu1 %873  ;;  %2381 = vpow2.f32 %v1163_v32 }
 0x1b8   : > { %v1165_v57 = vmul.f32 1.442695, %v1085_v39  ;;  %v1167_v11 = vmul.f32 1.442695, %v1086_v27  ;;  %v3202_v44 = vmax.f32 %v874_v35, -2.3819763e+38 }
 0x1ba   : > { %2383 = vpow2.f32 %v1165_v57  ;;  %v1087_v45 = vsub.f32 %v3010_v56, %v3202_v44  ;;  %v1088_v29 = vsub.f32 %v3012_v58, %v3202_v44 }
 0x1bb   : > { %2385 = vpow2.f32 %v1167_v11  ;;  %v877_v23 = vpop.xlane.xlu0 %876 }
 0x1bc   : > { %v2376_v50 = vpop.eup %2375  ;;  %v3208_v5 = vmax.f32 %v877_v23, -2.3819763e+38  ;;  %v1169_v17 = vmul.f32 1.442695, %v1087_v45  ;;  %v1171_v38 = vmul.f32 1.442695, %v1088_v29 }
 0x1bd   : > { %v2378_v51 = vpop.eup %2377 }
 0x1be   : > { %v1089_v32 = vsub.f32 %v3018_v61, %v3208_v5  ;;  %v1090_v39 = vsub.f32 %v3020_v62, %v3208_v5  ;;  %1643 = vmatprep.mubr.f32.mxu1 %v2378_v51  ;;  %v3214_v27 = vadd.f32 %v2378_v51, %v2376_v50  ;;  %2387 = vpow2.f32 %v1169_v17 }
 0x1bf   : > { %1644 = vmatmul.mubr.f32.vlgmr.msra.gmra.mrb[0].mxu1 %v2376_v50  ;;  %v880_v56 = vpop.xlane.xlu1 %879  ;;  %2389 = vpow2.f32 %v1171_v38 }
 0x1c0   : > { %v1173_v58 = vmul.f32 1.442695, %v1089_v32  ;;  %v1175_v35 = vmul.f32 1.442695, %v1090_v39  ;;  %v2380_v57 = vpop.eup %2379  ;;  %v3216_v11 = vmax.f32 %v880_v56, -2.3819763e+38 }
 0x1c1   : > { %v2382_v45 = vpop.eup %2381 }
 0x1c2   : > { %2391 = vpow2.f32 %v1173_v58  ;;  %v1091_v61 = vsub.f32 %v3028_v4, %v3216_v11  ;;  %v1092_v62 = vsub.f32 %v3030_v7, %v3216_v11  ;;  %1648 = vmatprep.mubr.f32.mxu1 %v2382_v45  ;;  %v3224_v51 = vadd.f32 %v2382_v45, %v2380_v57 }
 0x1c3   : > { %2393 = vpow2.f32 %v1175_v35  ;;  %v883_v29 = vpop.xlane.xlu0 %882  ;;  %1649 = vmatmul.mubr.f32.gmra.mrb[2].mxu1 %v2380_v57 }
 0x1c4   : > { %v2384_v23 = vpop.eup %2383  ;;  %v3222_v50 = vmax.f32 %v883_v29, -2.3819763e+38  ;;  %v1177_v38 = vmul.f32 1.442695, %v1091_v61  ;;  %v1179_v32 = vmul.f32 1.442695, %v1092_v62 }
 0x1c5   : > { %v2386_v17 = vpop.eup %2385 }
 0x1c6   : > { %v1093_v39 = vsub.f32 %v3036_v12, %v3222_v50  ;;  %v1094_v4 = vsub.f32 %v3040_v18, %v3222_v50  ;;  %1653 = vmatprep.mubr.f32.mxu1 %v2386_v17  ;;  %v3230_v56 = vadd.f32 %v2386_v17, %v2384_v23  ;;  %2395 = vpow2.f32 %v1177_v38 }
 0x1c7   : > { %v886_v7 = vpop.xlane.xlu1 %885  ;;  %2397 = vpow2.f32 %v1179_v32  ;;  %1654 = vmatmul.mubr.f32.gmra.mrb[4].mxu1 %v2384_v23 }
 0x1c8   : > { %v1181_v58 = vmul.f32 1.442695, %v1093_v39  ;;  %v1183_v35 = vmul.f32 1.442695, %v1094_v4  ;;  %v2388_v57 = vpop.eup %2387  ;;  %v3232_v45 = vmax.f32 %v886_v7, -2.3819763e+38 }
 0x1c9   : > { %v2390_v61 = vpop.eup %2389 }
 0x1ca   : > { %2399 = vpow2.f32 %v1181_v58  ;;  %v1095_v12 = vsub.f32 %v3044_v24, %v3232_v45  ;;  %v1096_v18 = vsub.f32 %v3049_v30, %v3232_v45  ;;  %1658 = vmatprep.mubr.f32.mxu1 %v2390_v61  ;;  %v3240_v38 = vadd.f32 %v2390_v61, %v2388_v57 }
 0x1cb   : > { %2401 = vpow2.f32 %v1183_v35  ;;  %v889_v62 = vpop.xlane.xlu0 %888  ;;  %1659 = vmatmul.mubr.f32.gmra.mrb[6].mxu1 %v2388_v57 }
 0x1cc   : > { %v2392_v29 = vpop.eup %2391  ;;  %v3238_v17 = vmax.f32 %v889_v62, -2.3819763e+38  ;;  %v1185_v32 = vmul.f32 1.442695, %v1095_v12  ;;  %v1187_v39 = vmul.f32 1.442695, %v1096_v18 }
 0x1cd   : > { %v2394_v23 = vpop.eup %2393 }
 0x1ce   : > { %v1097_v4 = vsub.f32 %v3054_v36, %v3238_v17  ;;  %v1098_v24 = vsub.f32 %v3059_v41, %v3238_v17  ;;  %1663 = vmatprep.mubr.f32.mxu1 %v2394_v23  ;;  %v3246_v7 = vadd.f32 %v2394_v23, %v2392_v29  ;;  %2403 = vpow2.f32 %v1185_v32 }
 0x1cf   : > { %v892_v30 = vpop.xlane.xlu1 %891  ;;  %2405 = vpow2.f32 %v1187_v39  ;;  %1664 = vmatmul.mubr.f32.gmra.mrb[8].mxu1 %v2392_v29 }
 0x1d0   : > { %v1189_v58 = vmul.f32 1.442695, %v1097_v4  ;;  %v1191_v35 = vmul.f32 1.442695, %v1098_v24  ;;  %v2396_v57 = vpop.eup %2395  ;;  %v3248_v61 = vmax.f32 %v892_v30, -2.3819763e+38 }
 0x1d1   : > { %v2398_v12 = vpop.eup %2397 }
 0x1d2   : > { %2407 = vpow2.f32 %v1189_v58  ;;  %v1099_v36 = vsub.f32 %v3064_v46, %v3248_v61  ;;  %v1100_v41 = vsub.f32 %v3066_v47, %v3248_v61  ;;  %1668 = vmatprep.mubr.f32.mxu1 %v2398_v12  ;;  %v3256_v32 = vadd.f32 %v2398_v12, %v2396_v57 }
 0x1d3   : > { %2409 = vpow2.f32 %v1191_v35  ;;  %v895_v18 = vpop.xlane.xlu0 %894  ;;  %1669 = vmatmul.mubr.f32.gmra.mrb[10].mxu1 %v2396_v57 }
 0x1d4   : > { %v2400_v62 = vpop.eup %2399  ;;  %v3254_v23 = vmax.f32 %v895_v18, -2.3819763e+38  ;;  %v1193_v39 = vmul.f32 1.442695, %v1099_v36  ;;  %v1195_v4 = vmul.f32 1.442695, %v1100_v41 }
 0x1d5   : > { %v2402_v29 = vpop.eup %2401 }
 0x1d6   : > { %v1101_v24 = vsub.f32 %v3070_v49, %v3254_v23  ;;  %v1102_v46 = vsub.f32 %v3072_v52, %v3254_v23  ;;  %1673 = vmatprep.mubr.f32.mxu1 %v2402_v29  ;;  %v3262_v30 = vadd.f32 %v2402_v29, %v2400_v62  ;;  %2411 = vpow2.f32 %v1193_v39 }
 0x1d7   : > { %v898_v47 = vpop.xlane.xlu1 %897  ;;  %2413 = vpow2.f32 %v1195_v4  ;;  %1674 = vmatmul.mubr.f32.gmra.mrb[12].mxu1 %v2400_v62 }
 0x1d8   : > { %v1197_v58 = vmul.f32 1.442695, %v1101_v24  ;;  %v1199_v35 = vmul.f32 1.442695, %v1102_v46  ;;  %v2404_v57 = vpop.eup %2403  ;;  %v3264_v12 = vmax.f32 %v898_v47, -2.3819763e+38 }
 0x1d9   : > { %v2406_v36 = vpop.eup %2405 }
 0x1da   : > { %2415 = vpow2.f32 %v1197_v58  ;;  %v1103_v49 = vsub.f32 %v3076_v53, %v3264_v12  ;;  %v1104_v52 = vsub.f32 %v3078_v54, %v3264_v12  ;;  %1678 = vmatprep.mubr.f32.mxu1 %v2406_v36  ;;  %v3272_v39 = vadd.f32 %v2406_v36, %v2404_v57 }
 0x1db   : > { %2417 = vpow2.f32 %v1199_v35  ;;  %v901_v41 = vpop.xlane.xlu0 %900  ;;  %1679 = vmatmul.mubr.f32.gmra.mrb[14].mxu1 %v2404_v57 }
 0x1dc   : > { %v2408_v18 = vpop.eup %2407  ;;  %v3270_v29 = vmax.f32 %v901_v41, -2.3819763e+38  ;;  %v1201_v4 = vmul.f32 1.442695, %v1103_v49  ;;  %v1203_v24 = vmul.f32 1.442695, %v1104_v52 }
 0x1dd   : > { %v2410_v62 = vpop.eup %2409 }
 0x1de   : > { %v1105_v46 = vsub.f32 %v3082_v59, %v3270_v29  ;;  %v1106_v53 = vsub.f32 %v3084_v60, %v3270_v29  ;;  %1683 = vmatprep.mubr.f32.mxu1 %v2410_v62  ;;  %v3278_v47 = vadd.f32 %v2410_v62, %v2408_v18  ;;  %2419 = vpow2.f32 %v1201_v4 }
 0x1df   : > { %v904_v54 = vpop.xlane.xlu1 %903  ;;  %2421 = vpow2.f32 %v1203_v24  ;;  %1684 = vmatmul.mubr.f32.gmra.mrb[16].mxu1 %v2408_v18 }
 0x1e0   : > { %v1205_v58 = vmul.f32 1.442695, %v1105_v46  ;;  %v1207_v35 = vmul.f32 1.442695, %v1106_v53  ;;  %v2412_v57 = vpop.eup %2411  ;;  %v3280_v36 = vmax.f32 %v904_v54, -2.3819763e+38 }
 0x1e1   : > { %v2414_v49 = vpop.eup %2413 }
 0x1e2   : > { %2423 = vpow2.f32 %v1205_v58  ;;  %v1107_v59 = vsub.f32 %v3088_v1, %v3280_v36  ;;  %v1108_v60 = vsub.f32 %v3090_v2, %v3280_v36  ;;  %1688 = vmatprep.mubr.f32.mxu1 %v2414_v49  ;;  %v3288_v4 = vadd.f32 %v2414_v49, %v2412_v57 }
 0x1e3   : > { %2425 = vpow2.f32 %v1207_v35  ;;  %v907_v52 = vpop.xlane.xlu0 %906  ;;  %1689 = vmatmul.mubr.f32.gmra.mrb[18].mxu1 %v2412_v57 }
 0x1e4   : > { %v2416_v41 = vpop.eup %2415  ;;  %v3286_v62 = vmax.f32 %v907_v52, -2.3819763e+38  ;;  %v1209_v24 = vmul.f32 1.442695, %v1107_v59  ;;  %v1211_v46 = vmul.f32 1.442695, %v1108_v60 }
 0x1e5   : > { %v2418_v18 = vpop.eup %2417 }
 0x1e6   : > { %v1109_v53 = vsub.f32 %v3094_v10, %v3286_v62  ;;  %v1110_v1 = vsub.f32 %v3096_v13, %v3286_v62  ;;  %1693 = vmatprep.mubr.f32.mxu1 %v2418_v18  ;;  %v3294_v54 = vadd.f32 %v2418_v18, %v2416_v41  ;;  %2427 = vpow2.f32 %v1209_v24 }
 0x1e7   : > { %v910_v2 = vpop.xlane.xlu1 %909  ;;  %2429 = vpow2.f32 %v1211_v46  ;;  %1694 = vmatmul.mubr.f32.gmra.mrb[20].mxu1 %v2416_v41 }
 0x1e8   : > { %v1213_v58 = vmul.f32 1.442695, %v1109_v53  ;;  %v1215_v35 = vmul.f32 1.442695, %v1110_v1  ;;  %v2420_v57 = vpop.eup %2419  ;;  %v3296_v49 = vmax.f32 %v910_v2, -2.3819763e+38 }
 0x1e9   : > { %v2422_v59 = vpop.eup %2421 }
 0x1ea   : > { %2431 = vpow2.f32 %v1213_v58  ;;  %v1111_v10 = vsub.f32 %v3100_v19, %v3296_v49  ;;  %v1112_v13 = vsub.f32 %v3102_v22, %v3296_v49  ;;  %1698 = vmatprep.mubr.f32.mxu1 %v2422_v59  ;;  %v3304_v24 = vadd.f32 %v2422_v59, %v2420_v57 }
 0x1eb   : > { %2433 = vpow2.f32 %v1215_v35  ;;  %v913_v60 = vpop.xlane.xlu0 %912  ;;  %1699 = vmatmul.mubr.f32.gmra.mrb[22].mxu1 %v2420_v57 }
 0x1ec   : > { %v2424_v52 = vpop.eup %2423  ;;  %v3302_v18 = vmax.f32 %v913_v60, -2.3819763e+38  ;;  %v1217_v46 = vmul.f32 1.442695, %v1111_v10  ;;  %v1219_v53 = vmul.f32 1.442695, %v1112_v13 }
 0x1ed   : > { %v2426_v41 = vpop.eup %2425 }
 0x1ee   : > { %v1113_v1 = vsub.f32 %v3106_v28, %v3302_v18  ;;  %v1114_v19 = vsub.f32 %v3108_v31, %v3302_v18  ;;  %1703 = vmatprep.mubr.f32.mxu1 %v2426_v41  ;;  %v3310_v2 = vadd.f32 %v2426_v41, %v2424_v52  ;;  %2435 = vpow2.f32 %v1217_v46 }
 0x1ef   : > { %v916_v22 = vpop.xlane.xlu1 %915  ;;  %2437 = vpow2.f32 %v1219_v53  ;;  %1704 = vmatmul.mubr.f32.gmra.mrb[24].mxu1 %v2424_v52 }
 0x1f0   : > { %v1221_v58 = vmul.f32 1.442695, %v1113_v1  ;;  %v1223_v35 = vmul.f32 1.442695, %v1114_v19  ;;  %v2428_v57 = vpop.eup %2427  ;;  %v3312_v59 = vmax.f32 %v916_v22, -2.3819763e+38 }
 0x1f1   : > { %v2430_v10 = vpop.eup %2429 }
 0x1f2   : > { %3780 = vst [vmem:[#allocation20_spill] sm:$0xff] %v3312_v59  ;;  %2439 = vpow2.f32 %v1221_v58  ;;  %v1115_v28 = vsub.f32 %v3112_v37, %v3312_v59  ;;  %v1116_v31 = vsub.f32 %v3114_v40, %v3312_v59  ;;  %1708 = vmatprep.mubr.f32.mxu1 %v2430_v10  ;;  %v3320_v46 = vadd.f32 %v2430_v10, %v2428_v57 }
 0x1f3   : > { %2441 = vpow2.f32 %v1223_v35  ;;  %v919_v13 = vpop.xlane.xlu0 %918  ;;  %1709 = vmatmul.mubr.f32.gmra.mrb[26].mxu1 %v2428_v57 }
 0x1f4   : > { %v2432_v60 = vpop.eup %2431  ;;  %v3318_v41 = vmax.f32 %v919_v13, -2.3819763e+38  ;;  %v1225_v53 = vmul.f32 1.442695, %v1115_v28  ;;  %v1227_v1 = vmul.f32 1.442695, %v1116_v31 }
 0x1f5   : > { %v2434_v52 = vpop.eup %2433 }
 0x1f6   : > { %3781 = vst [vmem:[#allocation21_spill] sm:$0xff] %v3318_v41  ;;  %v1117_v19 = vsub.f32 %v3118_v43, %v3318_v41  ;;  %v1118_v37 = vsub.f32 %v3120_v48, %v3318_v41  ;;  %1713 = vmatprep.mubr.f32.mxu1 %v2434_v52  ;;  %v3326_v22 = vadd.f32 %v2434_v52, %v2432_v60  ;;  %2443 = vpow2.f32 %v1225_v53 }
 0x1f7   : > { %v847_v40 = vpop.xlane.xlu0 %846  ;;  %v922_v58 = vpop.xlane.xlu1 %921  ;;  %2445 = vpow2.f32 %v1227_v1  ;;  %1714 = vmatmul.mubr.f32.gmra.mrb[28].mxu1 %v2432_v60 }
 0x1f8   : > { %v1229_v35 = vmul.f32 1.442695, %v1117_v19  ;;  %v1231_v13 = vmul.f32 1.442695, %v1118_v37  ;;  %v2436_v57 = vpop.eup %2435  ;;  %v3328_v10 = vmax.f32 %v847_v40, -2.3819763e+38 }
 0x1f9   : > { %v3330_v28 = vmax.f32 %v922_v58, -2.3819763e+38  ;;  %v2438_v31 = vpop.eup %2437 }
 0x1fa   : > { %3782 = vst [vmem:[#allocation22_spill] sm:$0xff] %v3328_v10  ;;  %2447 = vpow2.f32 %v1229_v35  ;;  %v1069_v43 = vsub.f32 %v2918_v0, %v3328_v10  ;;  %v1070_v48 = vsub.f32 %v2922_v3, %v3328_v10  ;;  %1718 = vmatprep.mubr.f32.mxu1 %v2438_v31  ;;  %v3342_v0 = vadd.f32 %v2438_v31, %v2436_v57 }
 0x1fb   : > { %3783 = vst [vmem:[#allocation23_spill] sm:$0xff] %v3330_v28  ;;  %2449 = vpow2.f32 %v1231_v13  ;;  %v850_v52 = vpop.xlane.xlu0 %849  ;;  %v925_v53 = vpop.xlane.xlu1 %924  ;;  %v1119_v60 = vsub.f32 %v3124_v55, %v3330_v28  ;;  %v1120_v19 = vsub.f32 %v3126_v63, %v3330_v28  ;;  %1719 = vmatmul.mubr.f32.gmra.mrb[30].mxu1 %v2436_v57 }
 0x1fc   : > { %v2440_v1 = vpop.eup %2439  ;;  %v3340_v37 = vmax.f32 %v850_v52, -2.3819763e+38  ;;  %v1133_v58 = vmul.f32 1.442695, %v1069_v43  ;;  %v1135_v35 = vmul.f32 1.442695, %v1070_v48 }
 0x1fd   : > { %v2442_v40 = vpop.eup %2441  ;;  %v1233_v13 = vmul.f32 1.442695, %v1119_v60  ;;  %v1235_v3 = vmul.f32 1.442695, %v1120_v19  ;;  %v3348_v10 = vmax.f32 %v925_v53, -2.3819763e+38 }
 0x1fe   : > { %3784 = vst [vmem:[#allocation24_spill] sm:$0xff] %v3340_v37  ;;  %v1071_v41 = vsub.f32 %v2930_v8, %v3340_v37  ;;  %1723 = vmatprep.mubr.f32.mxu1 %v2442_v40  ;;  %2451 = vpow2.f32 %v1133_v58  ;;  %v1072_v55 = vsub.f32 %v2932_v9, %v3340_v37 }
 0x1ff   : > { %3785 = vst [vmem:[#allocation25_spill] sm:$0xff] %v3348_v10  ;;  %v853_v63 = vpop.xlane.xlu0 %852  ;;  %v928_v52 = vpop.xlane.xlu1 %927  ;;  %2453 = vpow2.f32 %v1135_v35  ;;  %1724 = vmatmul.mubr.f32.gmra.mrb[32].mxu1 %v2440_v1  ;;  %v1121_v9 = vsub.f32 %v3133_v16, %v3348_v10  ;;  %v1122_v53 = vsub.f32 %v3135_v25, %v3348_v10  ;;  %v3381_v10 = vadd.f32 %v2442_v40, %v2440_v1  ;;  %v3792_v1 = vld [vmem:[#allocation13_spill] sm:$0xff] }
 0x200   : > { %v1137_v28 = vmul.f32 1.442695, %v1071_v41  ;;  %v3350_v43 = vmax.f32 %v853_v63, -2.3819763e+38  ;;  %v3352_v57 = vpop.eup %2443  ;;  %2455 = vpow2.f32 %v1233_v13  ;;  %v1139_v31 = vmul.f32 1.442695, %v1072_v55 }
 0x201   : > { %v3354_v48 = vmax.f32 %v928_v52, -2.3819763e+38  ;;  %v3356_v8 = vpop.eup %2445  ;;  %2457 = vpow2.f32 %v1235_v3  ;;  %v1237_v13 = vmul.f32 1.442695, %v1121_v9  ;;  %v1239_v3 = vmul.f32 1.442695, %v1122_v53 }
 0x202   : > { %3786 = vst [vmem:[#allocation26_spill] sm:$0xff] %v3350_v43  ;;  %2459 = vpow2.f32 %v1137_v28  ;;  %v1073_v41 = vsub.f32 %v2940_v14, %v3350_v43  ;;  %v1074_v60 = vsub.f32 %v2942_v15, %v3350_v43  ;;  %1728 = vmatprep.mubr.f32.mxu1 %v3356_v8  ;;  %v3788_v15 = vld [vmem:[#allocation11_spill] sm:$0xff]  ;;  %v3800_v43 = vld [vmem:[#allocation10_spill] sm:$0xff] }
 0x203   : > { %3787 = vst [vmem:[#allocation27_spill] sm:$0xff] %v3354_v48  ;;  %v856_v19 = vpop.xlane.xlu0 %855  ;;  %v931_v58 = vpop.xlane.xlu1 %930  ;;  %2461 = vpow2.f32 %v1139_v31  ;;  %1729 = vmatmul.mubr.f32.gmra.mrb[34].mxu1 %v3352_v57  ;;  %v1123_v14 = vsub.f32 %v3142_v42, %v3354_v48  ;;  %v1124_v55 = vsub.f32 %v3788_v15, %v3354_v48 }
 0x204   : > { %v3367_v35 = vpop.eup %2447  ;;  %v1141_v25 = vmul.f32 1.442695, %v1073_v41  ;;  %v1143_v28 = vmul.f32 1.442695, %v1074_v60  ;;  %2463 = vpow2.f32 %v1237_v13  ;;  %v3376_v63 = vmax.f32 %v856_v19, -2.3819763e+38 }
 0x205   : > { %v3370_v16 = vpop.eup %2449  ;;  %v3378_v52 = vmax.f32 %v931_v58, -2.3819763e+38  ;;  %2465 = vpow2.f32 %v1239_v3  ;;  %v1241_v31 = vmul.f32 1.442695, %v1123_v14  ;;  %v1243_v41 = vmul.f32 1.442695, %v1124_v55 }
 0x206   : > { %3789 = vst [vmem:[#allocation11_spill] sm:$0xff] %v3376_v63  ;;  %1733 = vmatprep.mubr.f32.mxu1 %v3370_v16  ;;  %2467 = vpow2.f32 %v1141_v25  ;;  %v1075_v42 = vsub.f32 %v2950_v20, %v3376_v63  ;;  %v1076_v19 = vsub.f32 %v2952_v21, %v3376_v63  ;;  %v3791_v58 = vld [vmem:[#allocation12_spill] sm:$0xff] }
 0x207   : > { %3790 = vst [vmem:[#allocation28_spill] sm:$0xff] %v3378_v52  ;;  %v859_v9 = vpop.xlane.xlu0 %858  ;;  %v934_v53 = vpop.xlane.xlu1 %933  ;;  %1734 = vmatmul.mubr.f32.gmra.mrb[36].mxu1 %v3367_v35  ;;  %2469 = vpow2.f32 %v1143_v28  ;;  %v1125_v13 = vsub.f32 %v3791_v58, %v3378_v52  ;;  %v1126_v40 = vsub.f32 %v3792_v1, %v3378_v52 }
 0x208   : > { %v2452_v60 = vpop.eup %2451  ;;  %2471 = vpow2.f32 %v1241_v31  ;;  %v1145_v14 = vmul.f32 1.442695, %v1075_v42  ;;  %v1147_v20 = vmul.f32 1.442695, %v1076_v19  ;;  %v3396_v63 = vmax.f32 %v859_v9, -2.3819763e+38 }
 0x209   : > { %v2454_v3 = vpop.eup %2453  ;;  %2473 = vpow2.f32 %v1243_v41  ;;  %v1245_v15 = vmul.f32 1.442695, %v1125_v13  ;;  %v1247_v21 = vmul.f32 1.442695, %v1126_v40  ;;  %v3398_v58 = vmax.f32 %v934_v53, -2.3819763e+38 }
 0x20a   : > { %v3392_v25 = vpop.eup %2455  ;;  %1613 = vmatprep.mubr.f32.mxu0 %v2454_v3  ;;  %2475 = vpow2.f32 %v1145_v14  ;;  %3793 = vst [vmem:[#allocation12_spill] sm:$0xff] %v3396_v63  ;;  %v1293_v1 = vadd.f32 %v2454_v3, %v2452_v60  ;;  %v1077_v13 = vsub.f32 %v2960_v26, %v3396_v63  ;;  %v3796_v14 = vld [vmem:[#allocation8_spill] sm:$0xff]  ;;  %v3797_v53 = vld [vmem:[#allocation14_spill] sm:$0xff]  ;;  %v3799_v26 = vld [vmem:[#allocation9_spill] sm:$0xff] }
 0x20b   : > { %v862_v55 = vpop.xlane.xlu0 %861  ;;  %v3394_v28 = vpop.eup %2457  ;;  %3794 = vst [vmem:[#allocation13_spill] sm:$0xff] %v3398_v58  ;;  %1614 = vmatmul.mubr.f32.vlgmr.msra.gmra.mrb[64].mxu0 %v2452_v60  ;;  %2477 = vpow2.f32 %v1147_v20  ;;  %v1078_v9 = vsub.f32 %v3796_v14, %v3396_v63  ;;  %v1127_v40 = vsub.f32 %v3797_v53, %v3398_v58  ;;  %v3798_v20 = vld [vmem:[#allocation15_spill] sm:$0xff] }
 0x20c   : > { %v937_v31 = vpop.xlane.xlu1 %936  ;;  %v2460_v42 = vpop.eup %2459  ;;  %1738 = vmatprep.mubr.f32.mxu1 %v3394_v28  ;;  %v3401_v41 = vmax.f32 %v862_v55, -2.3819763e+38  ;;  %2479 = vpow2.f32 %v1245_v15  ;;  %v1128_v52 = vsub.f32 %v3798_v20, %v3398_v58  ;;  %1294 = vadd.xlane.f32.xlu0 %v1293_v1  ;;  %v1149_v15 = vmul.f32 1.442695, %v1077_v13  ;;  %v3801_v13 = vld [vmem:[#allocation16_spill] sm:$0xff] }
 0x20d   : > { %v2462_v19 = vpop.eup %2461  ;;  %1739 = vmatmul.mubr.f32.gmra.mrb[38].mxu1 %v3392_v25  ;;  %2481 = vpow2.f32 %v1247_v21  ;;  %v3412_v60 = vmax.f32 %v937_v31, -2.3819763e+38  ;;  %v1151_v55 = vmul.f32 1.442695, %v1078_v9  ;;  %v1249_v63 = vmul.f32 1.442695, %v1127_v40 }
 0x20e   : > { %3795 = vst [vmem:[#allocation29_spill] sm:$0xff] %v3401_v41  ;;  %1618 = vmatprep.mubr.f32.mxu0 %v2462_v19  ;;  %v2464_v3 = vpop.eup %2463  ;;  %v1079_v48 = vsub.f32 %v3799_v26, %v3401_v41  ;;  %v1251_v21 = vmul.f32 1.442695, %v1128_v52  ;;  %v1080_v53 = vsub.f32 %v3800_v43, %v3401_v41  ;;  %2483 = vpow2.f32 %v1149_v15  ;;  %v3802_v26 = vld [vmem:[#allocation17_spill] sm:$0xff] }
 0x20f   : > { %1619 = vmatmul.mubr.f32.gmra.mrb[66].mxu0 %v2460_v42  ;;  %v2466_v14 = vpop.eup %2465  ;;  %2485 = vpow2.f32 %v1151_v55  ;;  %v1129_v9 = vsub.f32 %v3801_v13, %v3412_v60  ;;  %v1130_v59 = vsub.f32 %v3802_v26, %v3412_v60  ;;  %v1296_v52 = vadd.f32 %v2462_v19, %v2460_v42 }
 0x210   : > { %v2468_v37 = vpop.eup %2467  ;;  %v1153_v20 = vmul.f32 1.442695, %v1079_v48  ;;  %1743 = vmatprep.mubr.f32.mxu1 %v2466_v14  ;;  %v940_v31 = vpop.xlane.xlu1 %939  ;;  %v1155_v58 = vmul.f32 1.442695, %v1080_v53  ;;  %2487 = vpow2.f32 %v1249_v63  ;;  %v3426_v13 = vadd.f32 %v3370_v16, %v3367_v35 }
 0x211   : > { %v2470_v1 = vpop.eup %2469  ;;  %1744 = vmatmul.mubr.f32.gmra.mrb[40].mxu1 %v2464_v3  ;;  %2489 = vpow2.f32 %v1251_v21  ;;  %v1253_v15 = vmul.f32 1.442695, %v1129_v9  ;;  %v1255_v48 = vmul.f32 1.442695, %v1130_v59  ;;  %v3422_v41 = vmax.f32 %v940_v31, -2.3819763e+38  ;;  %1297 = vadd.xlane.f32.xlu1 %v1296_v52 }
 0x212   : > { %v2472_v40 = vpop.eup %2471  ;;  %1623 = vmatprep.mubr.f32.mxu0 %v2470_v1  ;;  %2491 = vpow2.f32 %v1153_v20  ;;  %v1299_v53 = vadd.f32 %v2470_v1, %v2468_v37  ;;  %v3430_v63 = vadd.f32 %v3356_v8, %v3352_v57  ;;  %v3803_v59 = vld [vmem:[#allocation18_spill] sm:$0xff]  ;;  %v3804_v21 = vld [vmem:[#allocation19_spill] sm:$0xff]  ;;  %v1371_v35 = vadd.f32 %v2466_v14, %v2464_v3 }
 0x213   : > { %v2474_v43 = vpop.eup %2473  ;;  %1624 = vmatmul.mubr.f32.gmra.mrb[68].mxu0 %v2468_v37  ;;  %2493 = vpow2.f32 %v1155_v58  ;;  %v1131_v19 = vsub.f32 %v3803_v59, %v3422_v41  ;;  %v1132_v31 = vsub.f32 %v3804_v21, %v3422_v41  ;;  %v1368_v16 = vadd.f32 %v3394_v28, %v3392_v25 }
 0x214   : > { %v2476_v55 = vpop.eup %2475  ;;  %1748 = vmatprep.mubr.f32.mxu1 %v2474_v43  ;;  %2495 = vpow2.f32 %v1253_v15  ;;  %1300 = vadd.xlane.f32.xlu0 %v1299_v53  ;;  %v1374_v9 = vadd.f32 %v2474_v43, %v2472_v40  ;;  %v986_v21 = vsub.f32 -2.3819763e+38, %v3232_v45 }
 0x215   : > { %v2478_v42 = vpop.eup %2477  ;;  %1749 = vmatmul.mubr.f32.gmra.mrb[42].mxu1 %v2472_v40  ;;  %2497 = vpow2.f32 %v1255_v48  ;;  %v1257_v8 = vmul.f32 1.442695, %v1131_v19  ;;  %v1259_v58 = vmul.f32 1.442695, %v1132_v31 }
 0x216   : > { %v2480_v20 = vpop.eup %2479  ;;  %1628 = vmatprep.mubr.f32.mxu0 %v2478_v42  ;;  %v1302_v37 = vadd.f32 %v2478_v42, %v2476_v55 }
 0x217   : > { %v2482_v57 = vpop.eup %2481  ;;  %1629 = vmatmul.mubr.f32.gmra.mrb[70].mxu0 %v2476_v55  ;;  %2499 = vpow2.f32 %v1257_v8 }
 0x218   : > { %1753 = vmatprep.mubr.f32.mxu1 %v2482_v57  ;;  %1303 = vadd.xlane.f32.xlu1 %v1302_v37  ;;  %v1377_v1 = vadd.f32 %v2482_v57, %v2480_v20  ;;  %v2484_v26 = vpop.eup %2483  ;;  %2501 = vpow2.f32 %v1259_v58  ;;  %v987_v57 = vsub.f32 -2.3819763e+38, %v3238_v17 }
 0x219   : > { %1754 = vmatmul.mubr.f32.gmra.mrb[44].mxu1 %v2480_v20  ;;  %v2486_v52 = vpop.eup %2485 }
 0x21a   : > { %v2488_v15 = vpop.eup %2487  ;;  %1633 = vmatprep.mubr.f32.mxu0 %v2486_v52  ;;  %v1305_v3 = vadd.f32 %v2486_v52, %v2484_v26  ;;  %v988_v52 = vsub.f32 -2.3819763e+38, %v3248_v61 }
 0x21b   : > { %v2490_v14 = vpop.eup %2489  ;;  %1634 = vmatmul.mubr.f32.gmra.mrb[72].mxu0 %v2484_v26  ;;  %v1033_v26 = vmul.f32 1.442695, %v987_v57 }
 0x21c   : > { %v2492_v25 = vpop.eup %2491  ;;  %1758 = vmatprep.mubr.f32.mxu1 %v2490_v14  ;;  %1306 = vadd.xlane.f32.xlu0 %v1305_v3  ;;  %v1380_v28 = vadd.f32 %v2490_v14, %v2488_v15 }
 0x21d   : > { %v2494_v48 = vpop.eup %2493  ;;  %1759 = vmatmul.mubr.f32.gmra.mrb[46].mxu1 %v2488_v15 }
 0x21e   : > { %v2496_v55 = vpop.eup %2495  ;;  %1638 = vmatprep.mubr.f32.mxu0 %v2494_v48  ;;  %v1308_v53 = vadd.f32 %v2494_v48, %v2492_v25  ;;  %v1035_v48 = vmul.f32 1.442695, %v988_v52 }
 0x21f   : > { %v2498_v40 = vpop.eup %2497  ;;  %1639 = vmatmul.mubr.f32.gmra.mrb[74].mxu0 %v2492_v25  ;;  %v989_v25 = vsub.f32 -2.3819763e+38, %v3254_v23 }
 0x220   : > { %1763 = vmatprep.mubr.f32.mxu1 %v2498_v40  ;;  %1312 = vadd.xlane.f32.xlu0 %v3214_v27  ;;  %v1383_v43 = vadd.f32 %v2498_v40, %v2496_v55  ;;  %v979_v27 = vsub.f32 -2.3819763e+38, %v3184_v34 }
 0x221   : > { %v2500_v42 = vpop.eup %2499  ;;  %1764 = vmatmul.mubr.f32.gmra.mrb[48].mxu1 %v2496_v55  ;;  %1309 = vadd.xlane.f32.xlu1 %v1308_v53  ;;  %v1037_v61 = vmul.f32 1.442695, %v989_v25 }
 0x222   : > { %v2502_v59 = vpop.eup %2501 }
 0x223   : > { %1768 = vmatprep.mubr.f32.mxu1 %v2502_v59  ;;  %v1386_v19 = vadd.f32 %v2502_v59, %v2500_v42 }
 0x224   : > { %1318 = vadd.xlane.f32.xlu0 %v3230_v56  ;;  %v980_v56 = vsub.f32 -2.3819763e+38, %v3190_v33 }
 0x225   : > { %1769 = vmatmul.mubr.f32.gmra.mrb[50].mxu1 %v2500_v42  ;;  %1315 = vadd.xlane.f32.xlu1 %v3224_v51  ;;  %v1017_v51 = vmul.f32 1.442695, %v979_v27  ;;  %v990_v42 = vsub.f32 -2.3819763e+38, %v3264_v12 }
 0x227   : > { %2503 = vpow2.f32 %v1017_v51 }
 0x228   : > { %1324 = vadd.xlane.f32.xlu0 %v3246_v7  ;;  %v981_v7 = vsub.f32 -2.3819763e+38, %v3196_v6 }
 0x229   : > { %1321 = vadd.xlane.f32.xlu1 %v3240_v38  ;;  %v1019_v38 = vmul.f32 1.442695, %v980_v56 }
 0x22b   : > { %2505 = vpow2.f32 %v1019_v38  ;;  %v991_v38 = vsub.f32 -2.3819763e+38, %v3270_v29 }
 0x22c   : > { %1330 = vadd.xlane.f32.xlu0 %v3262_v30  ;;  %v982_v30 = vsub.f32 -2.3819763e+38, %v3202_v44  ;;  %v985_v44 = vsub.f32 -2.3819763e+38, %v3222_v50 }
 0x22d   : > { %1327 = vadd.xlane.f32.xlu1 %v3256_v32  ;;  %v1021_v32 = vmul.f32 1.442695, %v981_v7 }
 0x22f   : > { %2507 = vpow2.f32 %v1021_v32  ;;  %v1039_v32 = vmul.f32 1.442695, %v990_v42 }
 0x230   : > { %1336 = vadd.xlane.f32.xlu0 %v3278_v47  ;;  %v983_v47 = vsub.f32 -2.3819763e+38, %v3208_v5 }
 0x231   : > { %1333 = vadd.xlane.f32.xlu1 %v3272_v39  ;;  %v1023_v39 = vmul.f32 1.442695, %v982_v30 }
 0x233   : > { %2509 = vpow2.f32 %v1023_v39 }
 0x234   : > { %1342 = vadd.xlane.f32.xlu0 %v3294_v54  ;;  %v1025_v54 = vmul.f32 1.442695, %v983_v47 }
 0x235   : > { %1339 = vadd.xlane.f32.xlu1 %v3288_v4  ;;  %v2504_v4 = vpop.eup %2503 }
 0x236   : > { %v3463_v34 = vmul.f32 0.0, %v2504_v4  ;;  %2511 = vpow2.f32 %v1025_v54 }
 0x238   : > { %1348 = vadd.xlane.f32.xlu0 %v3310_v2  ;;  %v2506_v2 = vpop.eup %2505 }
 0x239   : > { %1345 = vadd.xlane.f32.xlu1 %v3304_v24  ;;  %v984_v24 = vsub.f32 -2.3819763e+38, %v3216_v11  ;;  %v2508_v5 = vpop.eup %2507 }
 0x23a   : > { %v3475_v31 = vmul.f32 0.0, %v2508_v5 }
 0x23c   : > { %1354 = vadd.xlane.f32.xlu0 %v3326_v22  ;;  %v1027_v22 = vmul.f32 1.442695, %v984_v24  ;;  %v1041_v24 = vmul.f32 1.442695, %v991_v38 }
 0x23d   : > { %1351 = vadd.xlane.f32.xlu1 %v3320_v46  ;;  %v2510_v20 = vpop.eup %2509 }
 0x23e   : > { %2513 = vpow2.f32 %v1027_v22  ;;  %v3481_v8 = vmul.f32 0.0, %v2510_v20  ;;  %v994_v20 = vsub.f32 -2.3819763e+38, %v3296_v49  ;;  %v3805_v49 = vld [vmem:[#allocation20_spill] sm:$0xff] }
 0x23f   : > { %v996_v52 = vsub.f32 -2.3819763e+38, %v3805_v49 }
 0x240   : > { %1360 = vadd.xlane.f32.xlu0 %v3381_v10  ;;  %v3469_v10 = vmul.f32 0.0, %v2506_v2  ;;  %v2512_v58 = vpop.eup %2511 }
 0x241   : > { %1357 = vadd.xlane.f32.xlu1 %v3342_v0  ;;  %v3487_v15 = vmul.f32 0.0, %v2512_v58 }
 0x244   : > { %1366 = vadd.xlane.f32.xlu0 %v3426_v13 }
 0x245   : > { %1363 = vadd.xlane.f32.xlu1 %v3430_v63  ;;  %v1029_v63 = vmul.f32 1.442695, %v985_v44  ;;  %v993_v44 = vsub.f32 -2.3819763e+38, %v3286_v62 }
 0x247   : > { %2515 = vpow2.f32 %v1029_v63  ;;  %v1045_v57 = vmul.f32 1.442695, %v993_v44 }
 0x248   : > { %1372 = vadd.xlane.f32.xlu0 %v1371_v35  ;;  %v2514_v3 = vpop.eup %2513 }
 0x249   : > { %1369 = vadd.xlane.f32.xlu1 %v1368_v16  ;;  %v1031_v16 = vmul.f32 1.442695, %v986_v21  ;;  %v3495_v53 = vmul.f32 0.0, %v2514_v3 }
 0x24b   : > { %2517 = vpow2.f32 %v1031_v16 }
 0x24c   : > { %1378 = vadd.xlane.f32.xlu0 %v1377_v1  ;;  %2519 = vpow2.f32 %v1033_v26  ;;  %v1047_v26 = vmul.f32 1.442695, %v994_v20 }
 0x24d   : > { %1375 = vadd.xlane.f32.xlu1 %v1374_v9  ;;  %2521 = vpow2.f32 %v1035_v48 }
 0x24e   : > { %2523 = vpow2.f32 %v1037_v61 }
 0x24f   : > { %2525 = vpow2.f32 %v1039_v32 }
 0x250   : > { %1384 = vadd.xlane.f32.xlu0 %v1383_v43  ;;  %2527 = vpow2.f32 %v1041_v24 }
 0x251   : > { %1381 = vadd.xlane.f32.xlu1 %v1380_v28  ;;  %v2516_v40 = vpop.eup %2515 }
 0x252   : > { %v3505_v51 = vmul.f32 0.0, %v2516_v40 }
 0x255   : > { %1387 = vadd.xlane.f32.xlu1 %v1386_v19  ;;  %v2518_v56 = vpop.eup %2517 }
 0x256   : > { %v3515_v4 = vmul.f32 0.0, %v2518_v56  ;;  %v2520_v54 = vpop.eup %2519  ;;  %v3807_v56 = vld [vmem:[#allocation24_spill] sm:$0xff] }
 0x257   : > { %v2522_v63 = vpop.eup %2521  ;;  %v974_v38 = vsub.f32 -2.3819763e+38, %v3807_v56 }
 0x258   : > { %v2524_v62 = vpop.eup %2523 }
 0x259   : > { %v2526_v48 = vpop.eup %2525  ;;  %v1007_v20 = vmul.f32 1.442695, %v974_v38 }
 0x25a   : > { %v2528_v24 = vpop.eup %2527 }
 0x292   : > { %v1645_v33 = vpop.f32.mrb[0].mxu1 }
 0x293   : > { %v3466_v46 = vadd.f32 %v1645_v33, %v3463_v34  ;;  %v1647_v6 = vpop.f32.mrb[1].mxu1  ;;  %v992_v33 = vsub.f32 -2.3819763e+38, %v3280_v36 }
 0x295   : > { %v1043_v21 = vmul.f32 1.442695, %v992_v33  ;;  %v3808_v33 = vld [vmem:[#allocation21_spill] sm:$0xff] }
 0x296   : > { %v1650_v0 = vpop.f32.mrb[2].mxu1 }
 0x297   : > { %v3472_v13 = vadd.f32 %v1650_v0, %v3469_v10  ;;  %v1652_v11 = vpop.f32.mrb[3].mxu1 }
 0x298   : > { %v3525_v11 = vmul.f32 0.0, %v2520_v54 }
 0x299   : > { %v3493_v55 = vpop.xlane.xlu0 %1294 }
 0x29a   : > { %v1655_v37 = vpop.f32.mrb[4].mxu1 }
 0x29b   : > { %v3478_v35 = vadd.f32 %v1655_v37, %v3475_v31  ;;  %v1657_v50 = vpop.f32.mrb[5].mxu1 }
 0x29e   : > { %v1660_v1 = vpop.f32.mrb[6].mxu1  ;;  %v3503_v27 = vpop.xlane.xlu1 %1297 }
 0x29f   : > { %v3484_v9 = vadd.f32 %v1660_v1, %v3481_v8  ;;  %v1662_v45 = vpop.f32.mrb[7].mxu1 }
 0x2a0   : > { %v3533_v45 = vmul.f32 0.0, %v2522_v63 }
 0x2a1   : > { %v3501_v23 = vpop.xlane.xlu0 %1300 }
 0x2a2   : > { %v1665_v14 = vpop.f32.mrb[8].mxu1 }
 0x2a3   : > { %v3491_v17 = vadd.f32 %v1665_v14, %v3487_v15  ;;  %v1667_v28 = vpop.f32.mrb[9].mxu1 }
 0x2a5   : > { %v3513_v47 = vpop.xlane.xlu1 %1303 }
 0x2a6   : > { %v1670_v43 = vpop.f32.mrb[10].mxu1 }
 0x2a7   : > { %v3499_v59 = vadd.f32 %v1670_v43, %v3495_v53  ;;  %v1672_v19 = vpop.f32.mrb[11].mxu1  ;;  %v3806_v43 = vld [vmem:[#allocation22_spill] sm:$0xff] }
 0x2a8   : > { %v973_v61 = vsub.f32 -2.3819763e+38, %v3806_v43  ;;  %v1051_v19 = vmul.f32 1.442695, %v996_v52 }
 0x2a9   : > { %v3511_v39 = vpop.xlane.xlu0 %1306 }
 0x2aa   : > { %v1675_v7 = vpop.f32.mrb[12].mxu1  ;;  %v1005_v44 = vmul.f32 1.442695, %v973_v61 }
 0x2ab   : > { %v3509_v30 = vadd.f32 %v1675_v7, %v3505_v51  ;;  %v1677_v12 = vpop.f32.mrb[13].mxu1 }
 0x2ad   : > { %v1313_v22 = vpop.xlane.xlu0 %1312 }
 0x2ae   : > { %v1680_v2 = vpop.f32.mrb[14].mxu1  ;;  %v1395_v5 = vadd.f32 %v1313_v22, %v3463_v34  ;;  %v3523_v0 = vpop.xlane.xlu1 %1309  ;;  %v995_v34 = vsub.f32 -2.3819763e+38, %v3302_v18 }
 0x2af   : > { %v3519_v29 = vadd.f32 %v1680_v2, %v3515_v4  ;;  %v1682_v6 = vpop.f32.mrb[15].mxu1  ;;  %v997_v2 = vsub.f32 -2.3819763e+38, %v3808_v33 }
 0x2b0   : > { %2529 = vrcp.f32 %v1395_v5  ;;  %v1049_v40 = vmul.f32 1.442695, %v995_v34  ;;  %v3553_v6 = vmul.f32 0.0, %v2526_v48  ;;  %v3809_v5 = vld [vmem:[#allocation26_spill] sm:$0xff] }
 0x2b1   : > { %v1319_v16 = vpop.xlane.xlu0 %1318  ;;  %2531 = vpow2.f32 %v1043_v21  ;;  %v975_v63 = vsub.f32 -2.3819763e+38, %v3809_v5 }
 0x2b2   : > { %v1685_v36 = vpop.f32.mrb[16].mxu1  ;;  %v1397_v58 = vadd.f32 %v1319_v16, %v3475_v31  ;;  %v1316_v1 = vpop.xlane.xlu1 %1315  ;;  %v3541_v31 = vmul.f32 0.0, %v2524_v62 }
 0x2b3   : > { %v3529_v37 = vadd.f32 %v1685_v36, %v3525_v11  ;;  %v1687_v50 = vpop.f32.mrb[17].mxu1  ;;  %v1396_v3 = vadd.f32 %v1316_v1, %v3469_v10  ;;  %v1279_v1 = vmul.f32 0.0, %v2528_v24  ;;  %v3813_v24 = vld [vmem:[#allocation11_spill] sm:$0xff] }
 0x2b4   : > { %2533 = vrcp.f32 %v1397_v58  ;;  %v1053_v58 = vmul.f32 1.442695, %v997_v2 }
 0x2b5   : > { %2535 = vrcp.f32 %v1396_v3  ;;  %v1325_v18 = vpop.xlane.xlu0 %1324 }
 0x2b6   : > { %v1690_v14 = vpop.f32.mrb[18].mxu1  ;;  %v1399_v42 = vadd.f32 %v1325_v18, %v3487_v15  ;;  %v1322_v10 = vpop.xlane.xlu1 %1321  ;;  %2537 = vpow2.f32 %v1045_v57 }
 0x2b7   : > { %v3539_v25 = vadd.f32 %v1690_v14, %v3533_v45  ;;  %v1692_v28 = vpop.f32.mrb[19].mxu1  ;;  %v1398_v7 = vadd.f32 %v1322_v10, %v3481_v8  ;;  %2539 = vpow2.f32 %v1047_v26 }
 0x2b8   : > { %2541 = vrcp.f32 %v1399_v42  ;;  %v3811_v28 = vld [vmem:[#allocation23_spill] sm:$0xff] }
 0x2b9   : > { %2543 = vrcp.f32 %v1398_v7  ;;  %v1331_v15 = vpop.xlane.xlu0 %1330  ;;  %v998_v18 = vsub.f32 -2.3819763e+38, %v3811_v28 }
 0x2ba   : > { %v1695_v32 = vpop.f32.mrb[20].mxu1  ;;  %v2530_v22 = vpop.eup %2529  ;;  %v1401_v8 = vadd.f32 %v1331_v15, %v3505_v51  ;;  %2545 = vpow2.f32 %v1049_v40 }
 0x2bb   : > { %v3550_v12 = vadd.f32 %v1695_v32, %v3541_v31  ;;  %v1697_v54 = vpop.f32.mrb[21].mxu1  ;;  %v1328_v21 = vpop.xlane.xlu1 %1327  ;;  %v1975_v36 = vmul.f32 %v2530_v22, %v3466_v46  ;;  %2547 = vpow2.f32 %v1051_v19  ;;  %v3810_v46 = vld [vmem:[#allocation25_spill] sm:$0xff]  ;;  %v1055_v15 = vmul.f32 1.442695, %v998_v18 }
 0x2bc   : > { %v1400_v50 = vadd.f32 %v1328_v21, %v3495_v53  ;;  %2549 = vrcp.f32 %v1401_v8  ;;  %v2532_v34 = vpop.eup %2531  ;;  %v999_v49 = vsub.f32 -2.3819763e+38, %v3810_v46  ;;  %v1009_v53 = vmul.f32 1.442695, %v975_v63 }
 0x2bd   : > { %2007 = vst [vmem:[%s3562_s19 + $0x30] sm:$0xff] %v1975_v36  ;;  %v1337_v51 = vpop.xlane.xlu0 %1336  ;;  %v1280_v32 = vmul.f32 0.0, %v2532_v34 }
 0x2be   : > { %v1700_v16 = vpop.f32.mrb[22].mxu1  ;;  %2551 = vrcp.f32 %v1400_v50  ;;  %v2534_v26 = vpop.eup %2533  ;;  %v1403_v52 = vadd.f32 %v1337_v51, %v3525_v11  ;;  %v3812_v11 = vld [vmem:[#allocation27_spill] sm:$0xff] }
 0x2bf   : > { %v3560_v62 = vadd.f32 %v1700_v16, %v3553_v6  ;;  %v1702_v57 = vpop.f32.mrb[23].mxu1  ;;  %2553 = vpow2.f32 %v1005_v44  ;;  %v1334_v3 = vpop.xlane.xlu1 %1333  ;;  %v1977_v48 = vmul.f32 %v2534_v26, %v3478_v35  ;;  %v1000_v38 = vsub.f32 -2.3819763e+38, %v3812_v11  ;;  %v3815_v26 = vld [vmem:[#allocation12_spill] sm:$0xff] }
 0x2c0   : > { %v2536_v14 = vpop.eup %2535  ;;  %2555 = vpow2.f32 %v1007_v20  ;;  %v1402_v40 = vadd.f32 %v1334_v3, %v3515_v4  ;;  %v1057_v35 = vmul.f32 1.442695, %v999_v49  ;;  %v976_v4 = vsub.f32 -2.3819763e+38, %v3813_v24 }
 0x2c1   : > { %v2538_v61 = vpop.eup %2537  ;;  %v1976_v42 = vmul.f32 %v2536_v14, %v3472_v13  ;;  %2557 = vrcp.f32 %v1403_v52  ;;  %2009 = vst [vmem:[%s3562_s19 + $0x40] sm:$0xff] %v1977_v48  ;;  %v1343_v7 = vpop.xlane.xlu0 %1342  ;;  %v977_v46 = vsub.f32 -2.3819763e+38, %v3815_v26  ;;  %v3816_v48 = vld [vmem:[#allocation13_spill] sm:$0xff] }
 0x2c2   : > { %v1705_v43 = vpop.f32.mrb[24].mxu1  ;;  %v2540_v56 = vpop.eup %2539  ;;  %2559 = vrcp.f32 %v1402_v40  ;;  %v1405_v13 = vadd.f32 %v1343_v7, %v3541_v31  ;;  %v1059_v31 = vmul.f32 1.442695, %v1000_v38  ;;  %v1281_v16 = vmul.f32 0.0, %v2538_v61 }
 0x2c3   : > { %v3571_v10 = vadd.f32 %v1705_v43, %v1279_v1  ;;  %v1707_v19 = vpop.f32.mrb[25].mxu1  ;;  %v2542_v54 = vpop.eup %2541  ;;  %2561 = vpow2.f32 %v1009_v53  ;;  %2008 = vst [vmem:[%s3562_s19 + $0x38] sm:$0xff] %v1976_v42  ;;  %v1011_v57 = vmul.f32 1.442695, %v976_v4  ;;  %v1002_v40 = vsub.f32 -2.3819763e+38, %v3816_v48 }
 0x2c4   : > { %v1340_v33 = vpop.xlane.xlu1 %1339  ;;  %v2544_v2 = vpop.eup %2543  ;;  %v1979_v22 = vmul.f32 %v2542_v54, %v3491_v17  ;;  %2563 = vpow2.f32 %v1053_v58  ;;  %v1282_v19 = vmul.f32 0.0, %v2540_v56 }
 0x2c5   : > { %v1404_v44 = vadd.f32 %v1340_v33, %v3533_v45  ;;  %v2546_v63 = vpop.eup %2545  ;;  %v1978_v8 = vmul.f32 %v2544_v2, %v3484_v9  ;;  %2565 = vrcp.f32 %v1405_v13  ;;  %v1349_v50 = vpop.xlane.xlu0 %1348  ;;  %v3814_v45 = vld [vmem:[#allocation28_spill] sm:$0xff] }
 0x2c6   : > { %v1710_v5 = vpop.f32.mrb[26].mxu1  ;;  %v3583_v36 = vpop.eup %2547  ;;  %2011 = vst [vmem:[%s3562_s19 + $0x50] sm:$0xff] %v1979_v22  ;;  %v1001_v34 = vsub.f32 -2.3819763e+38, %v3814_v45  ;;  %v1407_v58 = vadd.f32 %v1349_v50, %v1279_v1  ;;  %v1283_v4 = vmul.f32 0.0, %v2546_v63 }
 0x2c7   : > { %v3581_v21 = vadd.f32 %v1710_v5, %v1280_v32  ;;  %v1712_v20 = vpop.f32.mrb[27].mxu1  ;;  %2567 = vrcp.f32 %v1404_v44  ;;  %v2550_v17 = vpop.eup %2549  ;;  %2010 = vst [vmem:[%s3562_s19 + $0x48] sm:$0xff] %v1978_v8  ;;  %v1003_v5 = vsub.f32 -2.3819763e+38, %v3412_v60 }
 0x2c8   : > { %v1346_v51 = vpop.xlane.xlu1 %1345  ;;  %2569 = vpow2.f32 %v1057_v35  ;;  %v2552_v9 = vpop.eup %2551  ;;  %v1981_v49 = vmul.f32 %v2550_v17, %v3509_v30  ;;  %v1061_v30 = vmul.f32 1.442695, %v1001_v34 }
 0x2c9   : > { %v1406_v53 = vadd.f32 %v1346_v51, %v3553_v6  ;;  %2571 = vpow2.f32 %v1055_v15  ;;  %v2554_v3 = vpop.eup %2553  ;;  %v1980_v14 = vmul.f32 %v2552_v9, %v3499_v59  ;;  %v1355_v43 = vpop.xlane.xlu0 %1354  ;;  %v1013_v59 = vmul.f32 1.442695, %v977_v46 }
 0x2ca   : > { %v1715_v52 = vpop.f32.mrb[28].mxu1  ;;  %2573 = vrcp.f32 %v1407_v58  ;;  %v2556_v18 = vpop.eup %2555  ;;  %2013 = vst [vmem:[%s3562_s19 + $0x60] sm:$0xff] %v1981_v49  ;;  %v1409_v6 = vadd.f32 %v1355_v43, %v1281_v16  ;;  %v1063_v15 = vmul.f32 1.442695, %v1002_v40  ;;  %v3601_v56 = vmul.f32 0.0, %v2554_v3 }
 0x2cb   : > { %v3592_v28 = vadd.f32 %v1715_v52, %v1281_v16  ;;  %v1717_v1 = vpop.f32.mrb[29].mxu1  ;;  %2575 = vrcp.f32 %v1406_v53  ;;  %v2558_v61 = vpop.eup %2557  ;;  %2012 = vst [vmem:[%s3562_s19 + $0x58] sm:$0xff] %v1980_v14  ;;  %v3611_v51 = vmul.f32 0.0, %v2556_v18  ;;  %v1065_v46 = vmul.f32 1.442695, %v1003_v5 }
 0x2cc   : > { %2577 = vpow2.f32 %v1011_v57  ;;  %v1352_v42 = vpop.xlane.xlu1 %1351  ;;  %v2560_v11 = vpop.eup %2559  ;;  %v1983_v38 = vmul.f32 %v2558_v61, %v3529_v37  ;;  %v1389_v20 = vadd.f32 %v3493_v55, %v3601_v56  ;;  %v1284_v55 = vmul.f32 0.0, %v3583_v36 }
 0x2cd   : > { %v1408_v7 = vadd.f32 %v1352_v42, %v1280_v32  ;;  %2579 = vpow2.f32 %v1059_v31  ;;  %v2562_v35 = vpop.eup %2561  ;;  %v1982_v24 = vmul.f32 %v2560_v11, %v3519_v29  ;;  %v1361_v22 = vpop.xlane.xlu0 %1360  ;;  %v3817_v32 = vld [vmem:[#allocation29_spill] sm:$0xff]  ;;  %v1390_v52 = vadd.f32 %v3503_v27, %v3611_v51 }
 0x2ce   : > { %v1720_v54 = vpop.f32.mrb[30].mxu1  ;;  %2581 = vrcp.f32 %v1409_v6  ;;  %v2564_v2 = vpop.eup %2563  ;;  %2015 = vst [vmem:[%s3562_s19 + $0x70] sm:$0xff] %v1983_v38  ;;  %v978_v44 = vsub.f32 -2.3819763e+38, %v3817_v32  ;;  %v1411_v8 = vadd.f32 %v1361_v22, %v1283_v4  ;;  %v3626_v42 = vmul.f32 0.0, %v2562_v35 }
 0x2cf   : > { %v3599_v13 = vadd.f32 %v1720_v54, %v1282_v19  ;;  %v1722_v33 = vpop.f32.mrb[31].mxu1  ;;  %2583 = vrcp.f32 %v1408_v7  ;;  %v2566_v37 = vpop.eup %2565  ;;  %2014 = vst [vmem:[%s3562_s19 + $0x68] sm:$0xff] %v1982_v24  ;;  %v1285_v60 = vmul.f32 0.0, %v2564_v2 }
 0x2d0   : > { %v1358_v29 = vpop.xlane.xlu1 %1357  ;;  %2585 = vpow2.f32 %v1061_v30  ;;  %v1985_v31 = vmul.f32 %v2566_v37, %v3550_v12  ;;  %v1015_v12 = vmul.f32 1.442695, %v978_v44  ;;  %v1004_v30 = vsub.f32 -2.3819763e+38, %v3422_v41 }
 0x2d1   : > { %v2568_v63 = vpop.eup %2567  ;;  %2587 = vpow2.f32 %v1013_v59  ;;  %v1410_v50 = vadd.f32 %v1358_v29, %v1282_v19  ;;  %v1367_v9 = vpop.xlane.xlu0 %1366  ;;  %v1391_v54 = vadd.f32 %v3501_v23, %v3626_v42 }
 0x2d2   : > { %v1725_v16 = vpop.f32.mrb[32].mxu1  ;;  %v2570_v17 = vpop.eup %2569  ;;  %v1984_v57 = vmul.f32 %v2568_v63, %v3539_v25  ;;  %2589 = vrcp.f32 %v1411_v8  ;;  %2017 = vst [vmem:[%s3562_s19 + $0x80] sm:$0xff] %v1985_v31  ;;  %v1413_v49 = vadd.f32 %v1367_v9, %v1285_v60  ;;  %v1067_v2 = vmul.f32 1.442695, %v1004_v30 }
 0x2d3   : > { %v1796_v45 = vadd.f32 %v1725_v16, %v1283_v4  ;;  %v1727_v34 = vpop.f32.mrb[33].mxu1  ;;  %v2572_v58 = vpop.eup %2571  ;;  %2591 = vrcp.f32 %v1410_v50  ;;  %v3620_v48 = vmul.f32 0.0, %v2570_v17 }
 0x2d4   : > { %v2574_v26 = vpop.eup %2573  ;;  %2016 = vst [vmem:[%s3562_s19 + $0x78] sm:$0xff] %v1984_v57  ;;  %v1364_v53 = vpop.xlane.xlu1 %1363  ;;  %2593 = vpow2.f32 %v1063_v15  ;;  %v1286_v6 = vmul.f32 0.0, %v2572_v58 }
 0x2d5   : > { %v2576_v25 = vpop.eup %2575  ;;  %2595 = vrcp.f32 %v1389_v20  ;;  %v1987_v3 = vmul.f32 %v2574_v26, %v3571_v10  ;;  %v1412_v14 = vadd.f32 %v1364_v53, %v1284_v55  ;;  %v1373_v27 = vpop.xlane.xlu0 %1372 }
 0x2d6   : > { %v1730_v1 = vpop.f32.mrb[34].mxu1  ;;  %v2578_v18 = vpop.eup %2577  ;;  %v1986_v36 = vmul.f32 %v2576_v25, %v3560_v62  ;;  %2597 = vrcp.f32 %v1413_v49  ;;  %v1415_v62 = vadd.f32 %v1373_v27, %v3620_v48 }
 0x2d7   : > { %v3622_v40 = vadd.f32 %v1730_v1, %v1284_v55  ;;  %v1732_v43 = vpop.f32.mrb[35].mxu1  ;;  %v2580_v61 = vpop.eup %2579  ;;  %2019 = vst [vmem:[%s3562_s19 + $0x90] sm:$0xff] %v1987_v3  ;;  %2599 = vrcp.f32 %v1412_v14 }
 0x2d8   : > { %v2582_v10 = vpop.eup %2581  ;;  %2601 = vpow2.f32 %v1015_v12  ;;  %2018 = vst [vmem:[%s3562_s19 + $0x88] sm:$0xff] %v1986_v36  ;;  %v1370_v19 = vpop.xlane.xlu1 %1369  ;;  %v3635_v15 = vmul.f32 0.0, %v2580_v61 }
 0x2d9   : > { %v2584_v11 = vpop.eup %2583  ;;  %2603 = vrcp.f32 %v1390_v52  ;;  %v1989_v59 = vmul.f32 %v2582_v10, %v3592_v28  ;;  %v1414_v38 = vadd.f32 %v1370_v19, %v1286_v6  ;;  %v3637_v28 = vmul.f32 0.0, %v2578_v18 }
 0x2da   : > { %v1735_v41 = vpop.f32.mrb[36].mxu1  ;;  %v2586_v7 = vpop.eup %2585  ;;  %v1988_v35 = vmul.f32 %v2584_v11, %v3581_v21  ;;  %2605 = vpow2.f32 %v1065_v46 }
 0x2db   : > { %v1798_v24 = vadd.f32 %v1735_v41, %v1285_v60  ;;  %v1737_v4 = vpop.f32.mrb[37].mxu1  ;;  %v2588_v33 = vpop.eup %2587  ;;  %2021 = vst [vmem:[%s3562_s19 + $0xa0] sm:$0xff] %v1989_v59  ;;  %2607 = vrcp.f32 %v1414_v38  ;;  %v3640_v44 = vmul.f32 0.0, %v2586_v7  ;;  %v1392_v63 = vadd.f32 %v3513_v47, %v3637_v28 }
 0x2dc   : > { %v2590_v22 = vpop.eup %2589  ;;  %2020 = vst [vmem:[%s3562_s19 + $0x98] sm:$0xff] %v1988_v35  ;;  %2609 = vrcp.f32 %v1415_v62  ;;  %v1376_v37 = vpop.xlane.xlu1 %1375  ;;  %v3650_v55 = vmul.f32 0.0, %v2588_v33 }
 0x2dd   : > { %v2592_v32 = vpop.eup %2591  ;;  %v1991_v23 = vmul.f32 %v2590_v22, %v1796_v45  ;;  %v1379_v21 = vpop.xlane.xlu0 %1378  ;;  %v1416_v5 = vadd.f32 %v1376_v37, %v3635_v15  ;;  %2611 = vrcp.f32 %v1391_v54 }
 0x2de   : > { %v1615_v8 = vpop.f32.mrb[64].mxu0  ;;  %v2594_v29 = vpop.eup %2593  ;;  %v1990_v20 = vmul.f32 %v2592_v32, %v3599_v13  ;;  %2613 = vpow2.f32 %v1067_v2  ;;  %v1417_v60 = vadd.f32 %v1379_v21, %v3640_v44  ;;  %v1393_v52 = vadd.f32 %v3511_v39, %v3650_v55 }
 0x2df   : > { %v1774_v31 = vadd.f32 %v1615_v8, %v3601_v56  ;;  %v1617_v50 = vpop.f32.mrb[65].mxu0  ;;  %v2596_v16 = vpop.eup %2595  ;;  %2023 = vst [vmem:[%s3562_s19 + $0xb0] sm:$0xff] %v1991_v23  ;;  %2615 = vrcp.f32 %v1416_v5  ;;  %v1290_v3 = vmul.f32 0.0, %v2594_v29 }
 0x2e0   : > { %v1740_v17 = vpop.f32.mrb[38].mxu1  ;;  %v2598_v57 = vpop.eup %2597  ;;  %2022 = vst [vmem:[%s3562_s19 + $0xa8] sm:$0xff] %v1990_v20  ;;  %2617 = vrcp.f32 %v1392_v63 }
 0x2e1   : > { %v1969_v45 = vmul.f32 %v2596_v16, %v1774_v31  ;;  %v1799_v34 = vadd.f32 %v1740_v17, %v1286_v6  ;;  %v1742_v58 = vpop.f32.mrb[39].mxu1  ;;  %v2600_v47 = vpop.eup %2599  ;;  %v1993_v13 = vmul.f32 %v2598_v57, %v1798_v24  ;;  %2619 = vrcp.f32 %v1417_v60 }
 0x2e2   : > { %v1620_v9 = vpop.f32.mrb[66].mxu0  ;;  %v2602_v56 = vpop.eup %2601  ;;  %v1992_v26 = vmul.f32 %v2600_v47, %v3622_v40  ;;  %2621 = vrcp.f32 %v1393_v52 }
 0x2e3   : > { %2001 = vst [vmem:[%s3562_s19] sm:$0xff] %v1969_v45  ;;  %v1775_v12 = vadd.f32 %v1620_v9, %v3611_v51  ;;  %v1622_v46 = vpop.f32.mrb[67].mxu0  ;;  %v2604_v49 = vpop.eup %2603  ;;  %2025 = vst [vmem:[%s3562_s19 + $0xc0] sm:$0xff] %v1993_v13  ;;  %v1266_v43 = vmul.f32 0.0, %v2602_v56 }
 0x2e4   : > { %v1382_v53 = vpop.xlane.xlu1 %1381  ;;  %v2606_v25 = vpop.eup %2605  ;;  %2024 = vst [vmem:[%s3562_s19 + $0xb8] sm:$0xff] %v1992_v26 }
 0x2e5   : > { %v1970_v14 = vmul.f32 %v2604_v49, %v1775_v12  ;;  %v1745_v1 = vpop.f32.mrb[40].mxu1  ;;  %v2608_v18 = vpop.eup %2607  ;;  %v1418_v61 = vadd.f32 %v1382_v53, %v1290_v3  ;;  %v1394_v11 = vadd.f32 %v3523_v0, %v1266_v43 }
 0x2e6   : > { %v1800_v36 = vadd.f32 %v1745_v1, %v3620_v48  ;;  %v1747_v40 = vpop.f32.mrb[41].mxu1  ;;  %v2610_v51 = vpop.eup %2609  ;;  %v1994_v30 = vmul.f32 %v2608_v18, %v1799_v34  ;;  %v1291_v48 = vmul.f32 0.0, %v2606_v25 }
 0x2e7   : > { %2002 = vst [vmem:[%s3562_s19 + $0x8] sm:$0xff] %v1970_v14  ;;  %v1625_v27 = vpop.f32.mrb[68].mxu0  ;;  %v1385_v6 = vpop.xlane.xlu0 %1384  ;;  %2623 = vrcp.f32 %v1418_v61 }
 0x2e8   : > { %v1995_v10 = vmul.f32 %v2610_v51, %v1800_v36  ;;  %v1776_v39 = vadd.f32 %v1625_v27, %v3626_v42  ;;  %v1627_v62 = vpop.f32.mrb[69].mxu0  ;;  %v2612_v19 = vpop.eup %2611  ;;  %2026 = vst [vmem:[%s3562_s19 + $0xc8] sm:$0xff] %v1994_v30  ;;  %v1419_v24 = vadd.f32 %v1385_v6, %v1291_v48  ;;  %2625 = vrcp.f32 %v1394_v11 }
 0x2e9   : > { %v1750_v59 = vpop.f32.mrb[42].mxu1  ;;  %v2614_v38 = vpop.eup %2613 }
 0x2ea   : > { %2027 = vst [vmem:[%s3562_s19 + $0xd0] sm:$0xff] %v1995_v10  ;;  %v1971_v41 = vmul.f32 %v2612_v19, %v1776_v39  ;;  %v1801_v7 = vadd.f32 %v1750_v59, %v3635_v15  ;;  %v1752_v54 = vpop.f32.mrb[43].mxu1  ;;  %v2616_v35 = vpop.eup %2615  ;;  %v1292_v37 = vmul.f32 0.0, %v2614_v38  ;;  %2627 = vrcp.f32 %v1419_v24 }
 0x2eb   : > { %v1630_v42 = vpop.f32.mrb[70].mxu0  ;;  %v1388_v4 = vpop.xlane.xlu1 %1387 }
 0x2ec   : > { %2003 = vst [vmem:[%s3562_s19 + $0x10] sm:$0xff] %v1971_v41  ;;  %v1996_v33 = vmul.f32 %v2616_v35, %v1801_v7  ;;  %v1777_v0 = vadd.f32 %v1630_v42, %v3637_v28  ;;  %v1632_v2 = vpop.f32.mrb[71].mxu0  ;;  %v2618_v22 = vpop.eup %2617  ;;  %v1420_v8 = vadd.f32 %v1388_v4, %v1292_v37 }
 0x2ed   : > { %v1755_v32 = vpop.f32.mrb[44].mxu1  ;;  %v2620_v5 = vpop.eup %2619 }
 0x2ee   : > { %2028 = vst [vmem:[%s3562_s19 + $0xd8] sm:$0xff] %v1996_v33  ;;  %v1972_v23 = vmul.f32 %v2618_v22, %v1777_v0  ;;  %v1802_v15 = vadd.f32 %v1755_v32, %v3640_v44  ;;  %v1757_v21 = vpop.f32.mrb[45].mxu1  ;;  %v1635_v63 = vpop.f32.mrb[72].mxu0  ;;  %2629 = vrcp.f32 %v1420_v8 }
 0x2ef   : > { %v1778_v28 = vadd.f32 %v1635_v63, %v3650_v55  ;;  %v1637_v20 = vpop.f32.mrb[73].mxu0  ;;  %v2622_v31 = vpop.eup %2621 }
 0x2f0   : > { %2004 = vst [vmem:[%s3562_s19 + $0x18] sm:$0xff] %v1972_v23  ;;  %v1997_v29 = vmul.f32 %v2620_v5, %v1802_v15  ;;  %v1760_v50 = vpop.f32.mrb[46].mxu1 }
 0x2f1   : > { %v1973_v16 = vmul.f32 %v2622_v31, %v1778_v28  ;;  %v1803_v17 = vadd.f32 %v1760_v50, %v1290_v3  ;;  %v1762_v44 = vpop.f32.mrb[47].mxu1  ;;  %v2624_v57 = vpop.eup %2623 }
 0x2f2   : > { %2029 = vst [vmem:[%s3562_s19 + $0xe0] sm:$0xff] %v1997_v29  ;;  %v1640_v60 = vpop.f32.mrb[74].mxu0  ;;  %v2626_v47 = vpop.eup %2625 }
 0x2f3   : > { %2005 = vst [vmem:[%s3562_s19 + $0x20] sm:$0xff] %v1973_v16  ;;  %v1998_v45 = vmul.f32 %v2624_v57, %v1803_v17  ;;  %v1779_v34 = vadd.f32 %v1640_v60, %v1266_v43  ;;  %v1642_v58 = vpop.f32.mrb[75].mxu0 }
 0x2f4   : > { %v1765_v13 = vpop.f32.mrb[48].mxu1  ;;  %v2628_v26 = vpop.eup %2627 }
 0x2f5   : > { %2030 = vst [vmem:[%s3562_s19 + $0xe8] sm:$0xff] %v1998_v45  ;;  %v1974_v9 = vmul.f32 %v2626_v47, %v1779_v34  ;;  %v1804_v56 = vadd.f32 %v1765_v13, %v1291_v48  ;;  %v1767_v55 = vpop.f32.mrb[49].mxu1 }
 0x2f7   : > { %2006 = vst [vmem:[%s3562_s19 + $0x28] sm:$0xff] %v1974_v9  ;;  %v1999_v12 = vmul.f32 %v2628_v26, %v1804_v56 }
 0x2f8   : > { %v1770_v46 = vpop.f32.mrb[50].mxu1  ;;  %v2630_v25 = vpop.eup %2629 }
 0x2f9   : > { %2031 = vst [vmem:[%s3562_s19 + $0xf0] sm:$0xff] %v1999_v12  ;;  %v1805_v49 = vadd.f32 %v1770_v46, %v1292_v37  ;;  %v1772_v53 = vpop.f32.mrb[51].mxu1 }
 0x2fb   : > { %v2000_v52 = vmul.f32 %v2630_v25, %v1805_v49 }
 0x2fd   : > { %2032 = vst [vmem:[%s3562_s19 + $0xf8] sm:$0xff] %v2000_v52 }
 0x2fe   : > { %2644 = shalt.err (!%p2641_p5)
}
 0x2ff   : > { %s2645_s6 = scalar_lea.hbm %s3682_s28, 4096  ;;  %s2649_s9 = scalar_lea.hbm %s3738_s3, 8192 }
 0x300   : > { %p2646_p6 = scmp.ne.s32.totalorder %s3682_s28, %s2645_s6  ;;  %p2650_p10 = scmp.lt.u32.totalorder %s3682_s28, %s3738_s3 }
 0x301   : > { %p2651_p11 = scmp.lt.u32.totalorder %s2649_s9, %s2645_s6  ;;  %p2653_p13 = scmp.lt.u32.totalorder %s2645_s6, %s3682_s28 }
 0x302   : > { %p2647_p7 = pnand %p2646_p6, %p2776_p4 }
 0x303   : > { %p2652_p12 = por %p2651_p11, %p2650_p10 }
 0x304   : > { %p2648_p9 = pneg %p2647_p7 }
 0x305   : > { %p2654_p0 = por %p2653_p13, %p2652_p12 }
 0x307   : > { %p2655_p1 = pnand %p2654_p0, %p2648_p9 }
 0x309   : > { %2658 = shalt.err (!%p2655_p1)
}
 0x30a   : > { %s2714_s18 = smov 128   ;;  %s2715_s19 = smov 8  }
 0x30b   : > { %2316 = dma.vmem_to_hbm [thread:$0]  (%p2776_p4), %s3684_s23, 4096, %s3682_s28, %s3689_s15, %s2714_s18, %s2714_s18, %s2715_s19  }
 0x30c PF: > { %p2322_p2 = scmp.ge.s32.totalorder %s2709_s17, 2  ;;  %s2064_s21 = sand.u32 1, %s2689_s12  }
 0x30d   : > { %s2065_s26 = scalar_lea.sflag [#allocation6], %s2064_s21 }
 0x30e   : > { %p2319_p3 = pnand %p2322_p2, %p2783_p8 }
 0x310   : > { %2684 = dma.done.wait (!%p2319_p3), %s2065_s26, 4096  }
 0x311   : > { %2686 = vsyncadd (!%p2319_p3), %s2065_s26, 4294963200  ;;  %s16_s17 = sadd.s32 1, %s2709_s17   ;;  %s3818_s12 = smov %s2693_s13 }
 0x312   : > { %p13_p5 = scmp.ge.s32.totalorder %s16_s17, 4   ;;  %s3819_s13 = smov %s2697_s14 }
 0x313   : > { %s3820_s14 = smov %s2789_s25  ;;  %s3821_s15 = smov %s2705_s16 }
 0x314   : > { %s3822_s16 = smov %s3824_s20  ;;  %15 = sbr.rel (!%p13_p5) target bundleno = 4 (0x4), region = 81 }
 0x31b   :  { %2070 = vsyncpa [#allocation6], 1 }
 0x31c   :  { %2072 = vsyncpa [#allocation6 + $0x1], 1 }

</bundles_post_ra>
